<compile_context>
chip_gen: v5e
topology: v5e:2x2
jax: 0.10.0
libtpu: 0.0.40
codegen_flags: <defaults>
</compile_context>

<pallas_src>
import functools

import jax
import jax.numpy as jnp
from jax.experimental import pallas as pl
from jax.experimental.pallas import tpu as pltpu

NUM_CLASSES = 1000


def _round_up(x, m):
    return (x + m - 1) // m * m


def _supports_bf16_epilogue():
    # v5e ("TPU v5 lite") has no bf16 VPU/EUP path; keep its epilogue in f32.
    try:
        kind = jax.devices()[0].device_kind.lower()
    except Exception:
        return True
    return not ("v5 lite" in kind or "v5e" in kind or "v5lite" in kind)


_BF16_EPILOGUE = _supports_bf16_epilogue()


def _silu(x):
    # Single-EUP-op SiLU: x * sigmoid(x) == 0.5 * x * (1 + tanh(0.5 * x))
    return 0.5 * x * (1.0 + jnp.tanh(0.5 * x))


# ----------------------------------------------------------------------------
# Fused Pallas kernel: stem matmul -> head 1x1 -> global average pool
# ----------------------------------------------------------------------------

def _fused_backbone_kernel(p_ref, w_stem_ref, s_stem_ref, b_stem_ref,
                           w_head_ref, s_head_ref, b_head_ref,
                           o_ref, acc_ref, *, hw, tm, needs_mask, bf16_epi):
    sp = pl.program_id(1)
    n_sp = pl.num_programs(1)
    c_head = w_head_ref.shape[1]

    @pl.when(sp == 0)
    def _():
        acc_ref[...] = jnp.zeros_like(acc_ref)

    patches = p_ref[0]                                           # (tm, Kpad) bf16

    # stem conv3x3/s2 (im2col matmul) + folded BN + SiLU (f32; only 32 channels)
    y = jnp.dot(patches, w_stem_ref[...], preferred_element_type=jnp.float32)
    y = y * s_stem_ref[...] + b_stem_ref[...]
    y = _silu(y)

    # head 1x1 conv (32 -> 1280) + folded BN + SiLU; never leaves VMEM/vregs
    h = jnp.dot(y.astype(w_head_ref.dtype), w_head_ref[...],
                preferred_element_type=jnp.float32)
    h = h * s_head_ref[...] + b_head_ref[...]                    # f32 affine
    if bf16_epi:
        h = _silu(h.astype(jnp.bfloat16))                        # bf16 EUP/VALU
    else:
        h = _silu(h)                                             # f32 (v5e)

    def _psum(hv):
        # (tm, C) -> (8, C) sublane partial sums: pure VALU slab adds,
        # no per-step cross-sublane (XLU) reduce and no (1,C) masked store.
        return jnp.sum(hv.astype(jnp.float32).reshape(tm // 8, 8, c_head),
                       axis=0)

    if needs_mask:
        # Only the last spatial tile can contain padded rows.
        @pl.when(sp < n_sp - 1)
        def _():
            acc_ref[...] += _psum(h)

        @pl.when(sp == n_sp - 1)
        def _():
            row = sp * tm + jax.lax.broadcasted_iota(jnp.int32, (tm, 1), 0)
            acc_ref[...] += _psum(jnp.where(row < hw, h, jnp.zeros_like(h)))
    else:
        acc_ref[...] += _psum(h)

    @pl.when(sp == n_sp - 1)
    def _():
        pooled = jnp.sum(acc_ref[...], axis=0, keepdims=True) * (1.0 / hw)
        o_ref[0] = pooled.astype(o_ref.dtype)                    # (1, 1280) f32


def fused_backbone(patches, w_stem, s_stem, b_stem,
                   w_head, s_head, b_head, *, hw, tm):
    nb, hw_pad, kp = patches.shape
    c_stem = w_stem.shape[1]
    c_head = w_head.shape[1]
    assert hw_pad % tm == 0 and tm % 8 == 0
    n_sp = hw_pad // tm
    needs_mask = hw_pad > hw

    kernel = functools.partial(_fused_backbone_kernel, hw=hw, tm=tm,
                               needs_mask=needs_mask, bf16_epi=_BF16_EPILOGUE)
    out = pl.pallas_call(
        kernel,
        out_shape=jax.ShapeDtypeStruct((nb, 1, c_head), jnp.float32),
        grid_spec=pltpu.PrefetchScalarGridSpec(
            num_scalar_prefetch=0,
            grid=(nb, n_sp),
            in_specs=[
                pl.BlockSpec((1, tm, kp), lambda b, s: (b, s, 0)),   # patches tile
                pl.BlockSpec((kp, c_stem), lambda b, s: (0, 0)),     # W_stem (resident)
                pl.BlockSpec((1, c_stem), lambda b, s: (0, 0)),      # BN scale (stem)
                pl.BlockSpec((1, c_stem), lambda b, s: (0, 0)),      # BN bias  (stem)
                pl.BlockSpec((c_stem, c_head), lambda b, s: (0, 0)), # W_head (resident)
                pl.BlockSpec((1, c_head), lambda b, s: (0, 0)),      # BN scale (head)
                pl.BlockSpec((1, c_head), lambda b, s: (0, 0)),      # BN bias  (head)
            ],
            out_specs=pl.BlockSpec((1, 1, c_head), lambda b, s: (b, 0, 0)),
            scratch_shapes=[pltpu.VMEM((8, c_head), jnp.float32)],   # pool partial sums
        ),
        compiler_params=pltpu.CompilerParams(
            dimension_semantics=("parallel", "arbitrary"),
            vmem_limit_bytes=48 * 1024 * 1024),
    )(patches, w_stem, s_stem, b_stem, w_head, s_head, b_head)
    return out[:, 0, :]                                          # (N, 1280) f32


# ----------------------------------------------------------------------------
# Glue (im2col, parameter setup) — plain JAX layout plumbing
# ----------------------------------------------------------------------------

def im2col(x, k=3, stride=2, pad=1):
    """NCHW -> (N, Ho*Wo, C*k*k); column order matches torch conv weight
    .reshape(O, C*k*k) (C-major, then kh, then kw). Done in bf16."""
    N, C, H, W = x.shape
    xp = jnp.pad(x, ((0, 0), (0, 0), (pad, pad), (pad, pad)))
    Ho = (H + 2 * pad - k) // stride + 1
    Wo = (W + 2 * pad - k) // stride + 1
    cols = []
    for di in range(k):
        for dj in range(k):
            cols.append(xp[:, :, di:di + stride * Ho:stride,
                               dj:dj + stride * Wo:stride])      # (N, C, Ho, Wo)
    patches = jnp.stack(cols, axis=2)                            # (N, C, k*k, Ho, Wo)
    patches = patches.transpose(0, 3, 4, 1, 2).reshape(N, Ho * Wo, C * k * k)
    return patches, Ho, Wo


def fold_bn(gamma, beta, mean, var, eps=1e-3):
    scale = gamma / jnp.sqrt(var + eps)
    bias = beta - mean * scale
    return scale[None, :].astype(jnp.float32), bias[None, :].astype(jnp.float32)


def init_params(key, c_in=3, c_stem=32, in_features=1280,
                num_classes=NUM_CLASSES):
    ks = jax.random.split(key, 8)
    p = {}
    k_raw = c_in * 9
    k_pad = _round_up(k_raw, 8)                                   # 27 -> 32

    # stem conv: torch weight (O, C, 3, 3) -> (C*9, O) matmul weight, K zero-padded
    w_stem = 0.1 * jax.random.normal(ks[0], (c_stem, c_in, 3, 3), jnp.float32)
    w_stem = w_stem.reshape(c_stem, k_raw).T
    w_stem = jnp.pad(w_stem, ((0, k_pad - k_raw), (0, 0)))
    p["w_stem"] = w_stem.astype(jnp.bfloat16)
    p["s_stem"], p["b_stem"] = fold_bn(
        1.0 + 0.05 * jax.random.normal(ks[1], (c_stem,), jnp.float32),
        0.05 * jax.random.normal(ks[2], (c_stem,), jnp.float32),
        jnp.zeros((c_stem,), jnp.float32),
        jnp.ones((c_stem,), jnp.float32))

    # head 1x1 conv: torch weight (1280, 32, 1, 1) -> (32, 1280)
    w_head = 0.1 * jax.random.normal(ks[3], (in_features, c_stem, 1, 1), jnp.float32)
    p["w_head"] = w_head.reshape(in_features, c_stem).T.astype(jnp.bfloat16)
    p["s_head"], p["b_head"] = fold_bn(
        1.0 + 0.05 * jax.random.normal(ks[4], (in_features,), jnp.float32),
        0.05 * jax.random.normal(ks[5], (in_features,), jnp.float32),
        jnp.zeros((in_features,), jnp.float32),
        jnp.ones((in_features,), jnp.float32))

    # classifier Linear(1280, 1000): torch weight (1000, 1280) -> (1280, 1000);
    # runs outside the Pallas kernel as a batched f32 matmul.
    w_fc = 0.02 * jax.random.normal(ks[6], (num_classes, in_features), jnp.float32)
    p["w_fc"] = w_fc.T                                            # (1280, 1000) f32
    p["b_fc"] = 0.02 * jax.random.normal(ks[7], (num_classes,), jnp.float32)
    return p


@jax.jit
def backbone_forward(x, params):
    """x: (N, 3, H, W) float32 NCHW -> logits (N, 1000)."""
    patches, Ho, Wo = im2col(x.astype(jnp.bfloat16), k=3, stride=2, pad=1)
    hw = Ho * Wo
    k_raw = patches.shape[-1]
    k_pad = params["w_stem"].shape[0]

    # spatial row tile: up to 1024 rows, 16-row (bf16 sublane-pack) aligned;
    # pad HW to a tile multiple
    tm = min(1024, _round_up(hw, 16))
    hw_pad = _round_up(hw, tm)
    patches = jnp.pad(patches, ((0, 0), (0, hw_pad - hw), (0, k_pad - k_raw)))

    pooled = fused_backbone(
        patches,
        params["w_stem"], params["s_stem"], params["b_stem"],
        params["w_head"], params["s_head"], params["b_head"],
        hw=hw, tm=tm)                                             # (N, 1280) f32

    # classifier: batched over N at full MXU utilization, outside the kernel
    logits = jnp.dot(pooled, params["w_fc"],
                     preferred_element_type=jnp.float32) + params["b_fc"]
    return logits


if __name__ == "__main__":
    key = jax.random.PRNGKey(0)
    k_x, k_p = jax.random.split(key)
    x = jax.random.normal(k_x, (2, 3, 16, 16), jnp.float32)   # small NCHW input
    params = init_params(k_p)

    out = backbone_forward(x, params)
    jax.block_until_ready(out)
    assert out.shape == (2, NUM_CLASSES) and out.dtype == jnp.float32
    assert bool(jnp.all(jnp.isfinite(out)))
    print("KERNEL_OK")
</pallas_src>

<mosaic_0001>
module attributes {stable_mosaic.version = 11 : i64} {
  func.func @_fused_backbone_kernel(%arg0: i32, %arg1: i32, %arg2: memref<1x64x32xbf16, #tpu.memory_space<vmem>>, %arg3: memref<32x32xbf16, #tpu.memory_space<vmem>>, %arg4: memref<1x32xf32, #tpu.memory_space<vmem>>, %arg5: memref<1x32xf32, #tpu.memory_space<vmem>>, %arg6: memref<32x1280xbf16, #tpu.memory_space<vmem>>, %arg7: memref<1x1280xf32, #tpu.memory_space<vmem>>, %arg8: memref<1x1280xf32, #tpu.memory_space<vmem>>, %arg9: memref<1x1x1280xf32, #tpu.memory_space<vmem>>, %arg10: memref<8x1280xf32, #tpu.memory_space<vmem>>) attributes {dimension_semantics = [#tpu.dimension_semantics<parallel>, #tpu.dimension_semantics<arbitrary>], iteration_bounds = array<i64: 2, 1>, scalar_prefetch = 0 : i64, scratch_operands = 1 : i64, tpu.core_type = #tpu.core_type<tc>, window_params = [{transform_indices = @transform_0, window_bounds = array<i64: 1, 64, 32>}, {pipeline_mode = #tpu.pipeline_mode<synchronous>, transform_indices = @transform_1, window_bounds = array<i64: 32, 32>}, {pipeline_mode = #tpu.pipeline_mode<synchronous>, transform_indices = @transform_2, window_bounds = array<i64: 1, 32>}, {pipeline_mode = #tpu.pipeline_mode<synchronous>, transform_indices = @transform_3, window_bounds = array<i64: 1, 32>}, {pipeline_mode = #tpu.pipeline_mode<synchronous>, transform_indices = @transform_4, window_bounds = array<i64: 32, 1280>}, {pipeline_mode = #tpu.pipeline_mode<synchronous>, transform_indices = @transform_5, window_bounds = array<i64: 1, 1280>}, {pipeline_mode = #tpu.pipeline_mode<synchronous>, transform_indices = @transform_6, window_bounds = array<i64: 1, 1280>}, {transform_indices = @transform_7, window_bounds = array<i64: 1, 1, 1280>}]} {
    %c0_i32 = arith.constant 0 : i32
    %0 = arith.cmpi eq, %arg1, %c0_i32 : i32
    %1 = arith.extui %0 : i1 to i32
    %c0_i32_0 = arith.constant 0 : i32
    %2 = arith.cmpi ne, %1, %c0_i32_0 : i32
    scf.if %2 {
      %cst_29 = arith.constant 0.000000e+00 : f32
      %48 = vector.broadcast %cst_29 : f32 to vector<8x1280xf32>
      %c0_30 = arith.constant 0 : index
      %c0_31 = arith.constant 0 : index
      %49 = vector.load %arg10[%c0_30, %c0_31] : memref<8x1280xf32, #tpu.memory_space<vmem>>, vector<8x1280xf32>
      tpu.vector_store %arg10[%c0_30, %c0_31], %48 {strides = array<i32>} : memref<8x1280xf32, #tpu.memory_space<vmem>>, vector<8x1280xf32>,
    } else {
    }
    %c0 = arith.constant 0 : index
    %c0_1 = arith.constant 0 : index
    %c0_2 = arith.constant 0 : index
    %3 = vector.load %arg2[%c0, %c0_1, %c0_2] : memref<1x64x32xbf16, #tpu.memory_space<vmem>>, vector<1x64x32xbf16>
    %4 = vector.shape_cast %3 : vector<1x64x32xbf16> to vector<64x32xbf16>
    %c0_3 = arith.constant 0 : index
    %c0_4 = arith.constant 0 : index
    %5 = vector.load %arg3[%c0_3, %c0_4] : memref<32x32xbf16, #tpu.memory_space<vmem>>, vector<32x32xbf16>
    %cst = arith.constant dense<0.000000e+00> : vector<64x32xf32>
    %6 = tpu.matmul %4, %5, %cst {dimension_numbers = #tpu.dot_dimension_numbers<[1], [0], [0], [1], [0, 0, 1, 1], [], []>} : vector<64x32xbf16>, vector<32x32xbf16>, vector<64x32xf32> -> vector<64x32xf32>
    %c0_5 = arith.constant 0 : index
    %c0_6 = arith.constant 0 : index
    %7 = vector.load %arg4[%c0_5, %c0_6] : memref<1x32xf32, #tpu.memory_space<vmem>>, vector<1x32xf32>
    %8 = vector.broadcast %7 : vector<1x32xf32> to vector<64x32xf32>
    %9 = arith.mulf %6, %8 : vector<64x32xf32>
    %c0_7 = arith.constant 0 : index
    %c0_8 = arith.constant 0 : index
    %10 = vector.load %arg5[%c0_7, %c0_8] : memref<1x32xf32, #tpu.memory_space<vmem>>, vector<1x32xf32>
    %11 = vector.broadcast %10 : vector<1x32xf32> to vector<64x32xf32>
    %12 = arith.addf %9, %11 : vector<64x32xf32>
    %cst_9 = arith.constant 5.000000e-01 : f32
    %13 = vector.broadcast %cst_9 : f32 to vector<64x32xf32>
    %14 = arith.mulf %13, %12 : vector<64x32xf32>
    %cst_10 = arith.constant 5.000000e-01 : f32
    %15 = vector.broadcast %cst_10 : f32 to vector<64x32xf32>
    %16 = arith.mulf %15, %12 : vector<64x32xf32>
    %17 = math.tanh %16 : vector<64x32xf32>
    %cst_11 = arith.constant 1.000000e+00 : f32
    %18 = vector.broadcast %cst_11 : f32 to vector<64x32xf32>
    %19 = arith.addf %18, %17 : vector<64x32xf32>
    %20 = arith.mulf %14, %19 : vector<64x32xf32>
    %21 = arith.truncf %20 : vector<64x32xf32> to vector<64x32xbf16>
    %c0_12 = arith.constant 0 : index
    %c0_13 = arith.constant 0 : index
    %22 = vector.load %arg6[%c0_12, %c0_13] : memref<32x1280xbf16, #tpu.memory_space<vmem>>, vector<32x1280xbf16>
    %cst_14 = arith.constant dense<0.000000e+00> : vector<64x1280xf32>
    %23 = tpu.matmul %21, %22, %cst_14 {dimension_numbers = #tpu.dot_dimension_numbers<[1], [0], [0], [1], [0, 0, 1, 1], [], []>} : vector<64x32xbf16>, vector<32x1280xbf16>, vector<64x1280xf32> -> vector<64x1280xf32>
    %c0_15 = arith.constant 0 : index
    %c0_16 = arith.constant 0 : index
    %24 = vector.load %arg7[%c0_15, %c0_16] : memref<1x1280xf32, #tpu.memory_space<vmem>>, vector<1x1280xf32>
    %25 = vector.broadcast %24 : vector<1x1280xf32> to vector<64x1280xf32>
    %26 = arith.mulf %23, %25 : vector<64x1280xf32>
    %c0_17 = arith.constant 0 : index
    %c0_18 = arith.constant 0 : index
    %27 = vector.load %arg8[%c0_17, %c0_18] : memref<1x1280xf32, #tpu.memory_space<vmem>>, vector<1x1280xf32>
    %28 = vector.broadcast %27 : vector<1x1280xf32> to vector<64x1280xf32>
    %29 = arith.addf %26, %28 : vector<64x1280xf32>
    %30 = arith.truncf %29 : vector<64x1280xf32> to vector<64x1280xbf16>
    %cst_19 = arith.constant 5.000000e-01 : bf16
    %31 = vector.broadcast %cst_19 : bf16 to vector<64x1280xbf16>
    %32 = arith.mulf %31, %30 : vector<64x1280xbf16>
    %cst_20 = arith.constant 5.000000e-01 : bf16
    %33 = vector.broadcast %cst_20 : bf16 to vector<64x1280xbf16>
    %34 = arith.mulf %33, %30 : vector<64x1280xbf16>
    %35 = math.tanh %34 : vector<64x1280xbf16>
    %cst_21 = arith.constant 1.000000e+00 : bf16
    %36 = vector.broadcast %cst_21 : bf16 to vector<64x1280xbf16>
    %37 = arith.addf %36, %35 : vector<64x1280xbf16>
    %38 = arith.mulf %32, %37 : vector<64x1280xbf16>
    %c0_22 = arith.constant 0 : index
    %c0_23 = arith.constant 0 : index
    %39 = vector.load %arg10[%c0_22, %c0_23] : memref<8x1280xf32, #tpu.memory_space<vmem>>, vector<8x1280xf32>
    %40 = arith.extf %38 : vector<64x1280xbf16> to vector<64x1280xf32>
    %41 = vector.shape_cast %40 : vector<64x1280xf32> to vector<8x8x1280xf32>
    %cst_24 = arith.constant dense<0.000000e+00> : vector<8x1280xf32>
    %42 = vector.multi_reduction <add>, %41, %cst_24 [0] : vector<8x8x1280xf32> to vector<8x1280xf32>
    %43 = arith.addf %39, %42 : vector<8x1280xf32>
    %c0_25 = arith.constant 0 : index
    %c0_26 = arith.constant 0 : index
    %44 = vector.load %arg10[%c0_25, %c0_26] : memref<8x1280xf32, #tpu.memory_space<vmem>>, vector<8x1280xf32>
    tpu.vector_store %arg10[%c0_25, %c0_26], %43 {strides = array<i32>} : memref<8x1280xf32, #tpu.memory_space<vmem>>, vector<8x1280xf32>,
    %c0_i32_27 = arith.constant 0 : i32
    %45 = arith.cmpi eq, %arg1, %c0_i32_27 : i32
    %46 = arith.extui %45 : i1 to i32
    %c0_i32_28 = arith.constant 0 : i32
    %47 = arith.cmpi ne, %46, %c0_i32_28 : i32
    scf.if %47 {
      %c0_29 = arith.constant 0 : index
      %c0_30 = arith.constant 0 : index
      %48 = vector.load %arg10[%c0_29, %c0_30] : memref<8x1280xf32, #tpu.memory_space<vmem>>, vector<8x1280xf32>
      %cst_31 = arith.constant dense<0.000000e+00> : vector<1280xf32>
      %49 = vector.multi_reduction <add>, %48, %cst_31 [0] : vector<8x1280xf32> to vector<1280xf32>
      %50 = vector.shape_cast %49 : vector<1280xf32> to vector<1x1280xf32>
      %cst_32 = arith.constant 1.562500e-02 : f32
      %51 = vector.broadcast %cst_32 : f32 to vector<1x1280xf32>
      %52 = arith.mulf %50, %51 : vector<1x1280xf32>
      %c0_33 = arith.constant 0 : index
      %c0_34 = arith.constant 0 : index
      %c0_35 = arith.constant 0 : index
      %53 = vector.load %arg9[%c0_33, %c0_34, %c0_35] : memref<1x1x1280xf32, #tpu.memory_space<vmem>>, vector<1x1x1280xf32>
      %54 = vector.shape_cast %53 : vector<1x1x1280xf32> to vector<1x1280xf32>
      %55 = vector.shape_cast %52 : vector<1x1280xf32> to vector<1x1x1280xf32>
      tpu.vector_store %arg9[%c0_33, %c0_34, %c0_35], %55 {strides = array<i32>} : memref<1x1x1280xf32, #tpu.memory_space<vmem>>, vector<1x1x1280xf32>,
    } else {
    }
    return
  }
  func.func @transform_0(%arg0: i32, %arg1: i32) -> (i32, i32, i32) {
    %c0_i32 = arith.constant 0 : i32
    %c0_i32_0 = arith.constant 0 : i32
    return %arg0, %arg1, %c0_i32 : i32, i32, i32
  }
  func.func @transform_1(%arg0: i32, %arg1: i32) -> (i32, i32) {
    %c0_i32 = arith.constant 0 : i32
    %c0_i32_0 = arith.constant 0 : i32
    %c0_i32_1 = arith.constant 0 : i32
    return %c0_i32, %c0_i32_0 : i32, i32
  }
  func.func @transform_2(%arg0: i32, %arg1: i32) -> (i32, i32) {
    %c0_i32 = arith.constant 0 : i32
    %c0_i32_0 = arith.constant 0 : i32
    %c0_i32_1 = arith.constant 0 : i32
    return %c0_i32, %c0_i32_0 : i32, i32
  }
  func.func @transform_3(%arg0: i32, %arg1: i32) -> (i32, i32) {
    %c0_i32 = arith.constant 0 : i32
    %c0_i32_0 = arith.constant 0 : i32
    %c0_i32_1 = arith.constant 0 : i32
    return %c0_i32, %c0_i32_0 : i32, i32
  }
  func.func @transform_4(%arg0: i32, %arg1: i32) -> (i32, i32) {
    %c0_i32 = arith.constant 0 : i32
    %c0_i32_0 = arith.constant 0 : i32
    %c0_i32_1 = arith.constant 0 : i32
    return %c0_i32, %c0_i32_0 : i32, i32
  }
  func.func @transform_5(%arg0: i32, %arg1: i32) -> (i32, i32) {
    %c0_i32 = arith.constant 0 : i32
    %c0_i32_0 = arith.constant 0 : i32
    %c0_i32_1 = arith.constant 0 : i32
    return %c0_i32, %c0_i32_0 : i32, i32
  }
  func.func @transform_6(%arg0: i32, %arg1: i32) -> (i32, i32) {
    %c0_i32 = arith.constant 0 : i32
    %c0_i32_0 = arith.constant 0 : i32
    %c0_i32_1 = arith.constant 0 : i32
    return %c0_i32, %c0_i32_0 : i32, i32
  }
  func.func @transform_7(%arg0: i32, %arg1: i32) -> (i32, i32, i32) {
    %c0_i32 = arith.constant 0 : i32
    %c0_i32_0 = arith.constant 0 : i32
    %c0_i32_1 = arith.constant 0 : i32
    return %arg0, %c0_i32, %c0_i32_0 : i32, i32, i32
  }
}

</mosaic_0001>

<bundles_post_ra>
// kernel: backbone_forward.1
= control target key start
LH: loop header
LB: loop body
LE: loop exit
PB: predicated region body
PF: predicated region fallthrough
CT: control target
= control target key end

     0   :  { %12 = vsyncpa [#allocation4], 0  ;;  %s4286_s0 = inlined_call_operand.vmem [shape: bf16[2,64,32], index: 0, kind: input, shape index: {}]   ;;  %s4287_s1 = inlined_call_operand.hbm [shape: bf16[32,32], index: 1, kind: input, shape index: {}]   ;;  %s4288_s2 = inlined_call_operand.hbm [shape: f32[1,32], index: 2, kind: input, shape index: {}]   ;;  %s4289_s3 = inlined_call_operand.hbm [shape: f32[1,32], index: 3, kind: input, shape index: {}]   ;;  %s4290_s4 = inlined_call_operand.hbm [shape: bf16[32,1280], index: 4, kind: input, shape index: {}]   ;;  %s4291_s5 = inlined_call_operand.hbm [shape: f32[1,1280], index: 5, kind: input, shape index: {}]   ;;  %s4292_s6 = inlined_call_operand.hbm [shape: f32[1,1280], index: 6, kind: input, shape index: {}]   ;;  %s4293_s7 = inlined_call_operand.vmem [shape: f32[2,1,1280], index: 7, kind: output, shape index: {}]  }
   0x1   :  { %13 = vsyncpa [#allocation6], 0 }
   0x2   :  { %14 = vsyncpa [#allocation9], 0 }
   0x3   :  { %15 = vsyncpa [#allocation12], 0  ;;  %s3202_s24 = smov 0   ;;  %s3204_s25 = smov 0  }
   0x4   :  { %s3206_s26 = smov 0  }
   0x5 LB: > { %s244_s29 = sshll.u32 %s4288_s2, 4  ;;  %s2460_s30 = sadd.s32 4294967295, %s3150_s26   ;;  %s3150_s26 = sphi %s3206_s26, %s21_s26   ;;  %s3146_s25 = sphi %s3204_s25, %s4298_s25   ;;  %s3142_s24 = sphi %s3202_s24, %s4297_s24   ;;  %s245_s29 = int_to_ptr.hbm [resolvable:$true] %s244_s29 }
   0x6   : > { %p2462_p0 = scmp.ge.s32.totalorder %s3150_s26, 1  ;;  %p218_p1 = scmp.lt.s32.totalorder %s3150_s26, 3 }
   0x7   : > { %p3223_p2 = scmp.eq.s32.totalorder %s2460_s30, 0  ;;  %s3152_s10 = smov [#allocation5]  }
   0x8   : > { %p3227_p3 = pnand %p2462_p0, %p218_p1  ;;  %s246_s11 = sshll.u32 %s3152_s10, 4  ;;  %s247_s11 = int_to_ptr.vmem [resolvable:$true] %s246_s11 }
   0x9   : > { %s267_s14 = sshll.u32 %s4290_s4, 4  ;;  %s3153_s16 = smov [#allocation8]   ;;  %s268_s14 = int_to_ptr.hbm [resolvable:$true] %s267_s14 }
   0xa   : > { %p2687_p4 = pneg %p3227_p3  ;;  %s269_s17 = sshll.u32 %s3153_s16, 4  ;;  %s270_s17 = int_to_ptr.vmem [resolvable:$true] %s269_s17 }
   0xb   : > { %s3154_s18 = smov 640   ;;  %s3155_s19 = smov 40  }
   0xc   : > { %p3238_p5 = pnand %p3223_p2, %p2687_p4  ;;  %s229_s22 = sshll.u32 %s4287_s1, 4  ;;  %s230_s22 = int_to_ptr.hbm [resolvable:$true] %s229_s22 }
   0xd   : > { %s33_s23 = sadd.s32 1, %s3146_s25  ;;  %s3156_s27 = smov [#allocation3]  }
   0xe   : > { %2693 = dma.hbm_to_vmem [thread:$0]  (!%p3238_p5), %s245_s29, 16, %s247_s11, [#allocation6]  }
   0xf   : > { %2699 = dma.hbm_to_vmem [thread:$0]  (!%p3238_p5), %s268_s14, 2560, %s270_s17, [#allocation9], %s3154_s18, %s3154_s18, %s3155_s19  }
  0x10   : > { %p35_p6 = scmp.ge.s32.totalorder %s33_s23, 2  ;;  %s231_s28 = sshll.u32 %s3156_s27, 4  ;;  %s232_s28 = int_to_ptr.vmem [resolvable:$true] %s231_s28 }
  0x11   : > { %s3157_s30 = smov 64   ;;  %s3158_s29 = smov 4  }
  0x12   : > { %s4300_s23 = smov (%p35_p6, %s33_s23), 0  ;;  %s256_s12 = sshll.u32 %s4289_s3, 4  ;;  %s257_s12 = int_to_ptr.hbm [resolvable:$true] %s256_s12 }
  0x13   : > { %2690 = dma.hbm_to_vmem [thread:$0]  (!%p3238_p5), %s230_s22, 256, %s232_s28, [#allocation4], %s3157_s30, %s3157_s30, %s3158_s29  }
  0x14   : > { %s3159_s13 = smov [#allocation7]   ;;  %s282_s18 = sshll.u32 %s4291_s5, 4  ;;  %s283_s18 = int_to_ptr.hbm [resolvable:$true] %s282_s18 }
  0x15   : > { %s258_s14 = sshll.u32 %s3159_s13, 4  ;;  %s3160_s19 = smov [#allocation10]   ;;  %s259_s14 = int_to_ptr.vmem [resolvable:$true] %s258_s14 }
  0x16   : > { %2696 = dma.hbm_to_vmem [thread:$0]  (!%p3238_p5), %s257_s12, 16, %s259_s14, [#allocation6]  }
  0x17   : > { %s284_s20 = sshll.u32 %s3160_s19, 4  ;;  %s294_s27 = sshll.u32 %s4292_s6, 4  ;;  %s285_s20 = int_to_ptr.vmem [resolvable:$true] %s284_s20  ;;  %s295_s27 = int_to_ptr.hbm [resolvable:$true] %s294_s27 }
  0x18   : > { %2702 = dma.hbm_to_vmem [thread:$0]  (!%p3238_p5), %s283_s18, 160, %s285_s20, [#allocation9]  }
  0x19   : > { %s3161_s28 = smov [#allocation11]   ;;  %322 = sbr.rel (%p3227_p3) target bundleno = 677 (0x2a5), region = 48 }
  0x1a   : > { %s296_s30 = sshll.u32 %s3161_s28, 4  ;;  %s297_s30 = int_to_ptr.vmem [resolvable:$true] %s296_s30 }
  0x1b   : > { %2705 = dma.hbm_to_vmem [thread:$0]  (!%p3238_p5), %s295_s27, 160, %s297_s30, [#allocation12]  }
  0x1e   : > { %3125 = dma.done.wait (%p3223_p2), [#allocation4], 256  }
  0x1f   : > { %3127 = vsyncadd (%p3223_p2), [#allocation4], 4294967040 }
  0x20   : > { %3129 = dma.done.wait (%p3223_p2), [#allocation6], 32  }
  0x21   : > { %3131 = vsyncadd (%p3223_p2), [#allocation6], 4294967264 }
  0x22   : > { %3133 = dma.done.wait (%p3223_p2), [#allocation9], 2720  }
  0x23   : > { %3135 = vsyncadd (%p3223_p2), [#allocation9], 4294964576 }
  0x24   : > { %3137 = dma.done.wait (%p3223_p2), [#allocation12], 160  }
  0x25   : > { %3139 = vsyncadd (%p3223_p2), [#allocation12], 4294967136  ;;  %p384_p7 = scmp.lt.s32.totalorder %s3142_s24, 1  ;;  %v2635_v0 = vld [vmem:[#allocation3 + $0x8] sm:$0xff]  ;;  %v2634_v1 = vld [vmem:[#allocation3] sm:$0xff]  ;;  %vm456_vm0 = vcmask 261120  }
  0x26   : > { %475 = vmatpush.bf16.msra.mxu0 %v2635_v0  ;;  %2656 = vmatpush.bf16.msra.mxu3 %v2635_v0  ;;  %v2549_v6 = vld [vmem:[#allocation8 + $0x50] sm:$0xf]  ;;  %v2651_v7 = vld [vmem:[#allocation8 + $0x74] sm:$0xf0]  ;;  %v2652_v10 = vld [vmem:[#allocation8 + $0x7c] sm:$0xf0] }
  0x27   : > { %s4302_s24 = smov (!%p384_p7, %s3142_s24), 1  ;;  %v2557_v8 = vld [vmem:[#allocation8 + $0x58] sm:$0xf]  ;;  %v2550_v9 = vor.u32 %v2651_v7, %v2549_v6  ;;  %v2509_v12 = vld [vmem:[#allocation8] sm:$0xf]  ;;  %vm2309_vm1 = vcmask 1040384  }
  0x28   : > { %s2629_s9 = sshll.u32 %s4302_s24, 5  ;;  %v2558_v11 = vor.u32 %v2652_v10, %v2557_v8  ;;  %v2641_v13 = vld [vmem:[#allocation8 + $0x24] sm:$0xf0]  ;;  %v2642_v16 = vld [vmem:[#allocation8 + $0x2c] sm:$0xf0]  ;;  %vm2311_vm2 = vcmask 1042434  }
  0x29   : > { %s391_s10 = scalar_lea.vmem %s4286_s0, %s2629_s9  ;;  %2658 = vmatpush.bf16.msra.mxu1 %v2550_v9  ;;  %v2517_v14 = vld [vmem:[#allocation8 + $0x8] sm:$0xf]  ;;  %v2510_v15 = vor.u32 %v2641_v13, %v2509_v12  ;;  %v2646_v18 = vld [vmem:[#allocation8 + $0x54] sm:$0xf]  ;;  %v2551_v19 = vld [vmem:[#allocation8 + $0x78] sm:$0xf0] }
  0x2a   : > { %v2630_v2 = vld [vmem:[%s391_s10] sm:$0xff]  ;;  %v2631_v3 = vld [vmem:[%s391_s10 + $0x8] sm:$0xff]  ;;  %476 = vmatpush.bf16.msra.mxu0 %v2634_v1  ;;  %2657 = vmatpush.bf16.msra.mxu3 %v2634_v1  ;;  %v2632_v4 = vld [vmem:[%s391_s10 + $0x10] sm:$0xff]  ;;  %v2518_v17 = vor.u32 %v2642_v16, %v2517_v14  ;;  %v2554_v20 = vor.u32 %v2646_v18, %v2551_v19  ;;  %vm2313_vm3 = vcmask 1041408   ;;  %vm2315_vm4 = vcmask 1044484   ;;  %s2662_s8 = smul.u32 10, %s4302_s24 }
  0x2b   : > { %v2633_v5 = vld [vmem:[%s391_s10 + $0x18] sm:$0xff]  ;;  %v2511_v22 = vld [vmem:[#allocation8 + $0x28] sm:$0xf0]  ;;  %v3299_v24 = vld [vmem:[#allocation5] ss:$0 sm:$0xff]  ;;  %vm2317_vm5 = vcmask 1046534  }
  0x2c   : > { %2660 = vmatpush.bf16.msra.mxu2 %v2554_v20  ;;  %v2636_v21 = vld [vmem:[#allocation8 + $0x4] sm:$0xf]  ;;  %v3302_v27 = vld [vmem:[#allocation7] ss:$0 sm:$0xff]  ;;  %v2567_v42 = vld [vmem:[#allocation8 + $0x88] sm:$0xf0]  ;;  %s4256_s12 = scalar_lea.vmem %s4293_s7, %s2662_s8 }
  0x2d   : > { %2503 = vmatmul.msk.bf16.vlgmr.msra.gmra.mxu0 %vm456_vm0, %v2630_v2  ;;  %2504 = vmatmul.msk.bf16.vlgmr.msra.gmra.mxu3 %vm456_vm0, %v2631_v3  ;;  %v2514_v23 = vor.u32 %v2636_v21, %v2511_v22  ;;  %v2648_v41 = vld [vmem:[#allocation8 + $0x64] sm:$0xf]  ;;  %v2647_v48 = vld [vmem:[#allocation8 + $0x5c] sm:$0xf]  ;;  %v2565_v53 = vld [vmem:[#allocation8 + $0x60] sm:$0xf] }
  0x2e   : > { %696 = vmatpush.bf16.msrb.mxu0 %v2550_v9  ;;  %754 = vmatpush.bf16.msrb.mxu3 %v2558_v11  ;;  %v2570_v44 = vor.u32 %v2648_v41, %v2567_v42  ;;  %v2559_v49 = vld [vmem:[#allocation8 + $0x80] sm:$0xf0]  ;;  %v2653_v54 = vld [vmem:[#allocation8 + $0x84] sm:$0xf0]  ;;  %v2637_v63 = vld [vmem:[#allocation8 + $0xc] sm:$0xf] }
  0x2f   : > { %2659 = vmatpush.bf16.msra.mxu1 %v2510_v15  ;;  %v2566_v57 = vor.u32 %v2653_v54, %v2565_v53  ;;  %v2562_v60 = vor.u32 %v2647_v48, %v2559_v49  ;;  %v2519_v0 = vld [vmem:[#allocation8 + $0x30] sm:$0xf0]  ;;  %v2527_v11 = vld [vmem:[#allocation8 + $0x38] sm:$0xf0]  ;;  %v2525_v12 = vld [vmem:[#allocation8 + $0x10] sm:$0xf] }
  0x30   : > { %2661 = vmatpush.bf16.msra.mxu2 %v2514_v23  ;;  %v2638_v10 = vld [vmem:[#allocation8 + $0x14] sm:$0xf]  ;;  %vm2319_vm6 = vcmask 1045508   ;;  %vm2321_vm7 = vcmask 1043456  }
  0x31   : > { %v2530_v14 = vor.u32 %v2638_v10, %v2527_v11  ;;  %v2575_v42 = vld [vmem:[#allocation8 + $0x90] sm:$0xf0] }
  0x32   : > { %697 = vmatpush.bf16.msrb.mxu0 %v2510_v15  ;;  %755 = vmatpush.bf16.msrb.mxu3 %v2518_v17  ;;  %v2643_v15 = vld [vmem:[#allocation8 + $0x34] sm:$0xf0] }
  0x33   : > { %812 = vmatpush.bf16.msrb.mxu1 %v2566_v57  ;;  %v2526_v16 = vor.u32 %v2643_v15, %v2525_v12  ;;  %v2639_v57 = vld [vmem:[#allocation8 + $0x1c] sm:$0xf] }
  0x34   : > { %841 = vmatpush.bf16.msrb.mxu2 %v2570_v44  ;;  %v2655_v44 = vld [vmem:[#allocation8 + $0x94] sm:$0xf0] }
  0x36   : > { %725 = vmatpush.bf16.msra.mxu0 %v2554_v20 }
  0x37   : > { %813 = vmatpush.bf16.msrb.mxu1 %v2526_v16 }
  0x38   : > { %842 = vmatpush.bf16.msrb.mxu2 %v2530_v14 }
  0x3a   : > { %726 = vmatpush.bf16.msra.mxu0 %v2514_v23 }
  0x3d   : > { %2505 = vmatmul.msk.bf16.gmra.mxu3 %vm456_vm0, %v2632_v4  ;;  %v2522_v4 = vor.u32 %v2637_v63, %v2519_v0 }
  0x4d   : > { %2506 = vmatmul.msk.bf16.gmra.mxu3 %vm456_vm0, %v2633_v5 }
  0xaa   : > { %v478_v25 = vpop.f32.mrf.mxu0 }
  0xab   : > { %v502_v26 = vmul.f32 %v3299_v24, %v478_v25 }
  0xad   : > { %v514_v28 = vadd.f32 %v3302_v27, %v502_v26  ;;  %v2573_v26 = vld [vmem:[#allocation8 + $0x68] sm:$0xf] }
  0xaf   : > { %v522_v29 = vmul.f32 0.5, %v514_v28  ;;  %v2654_v28 = vld [vmem:[#allocation8 + $0x8c] sm:$0xf0] }
  0xb0   : > { %v483_v30 = vpop.f32.mrf.mxu3 }
  0xb1   : > { %v504_v31 = vmul.f32 %v3299_v24, %v483_v30  ;;  %2754 = vtanh.f32 %v522_v29  ;;  %v2574_v30 = vor.u32 %v2654_v28, %v2573_v26 }
  0xb2   : > { %v480_v32 = vpop.f32.mrf.mxu0 }
  0xb3   : > { %v516_v33 = vadd.f32 %v3302_v27, %v504_v31  ;;  %v503_v34 = vmul.f32 %v3299_v24, %v480_v32  ;;  %870 = vmatpush.bf16.msra.mxu3 %v2574_v30 }
  0xb5   : > { %v515_v35 = vadd.f32 %v3302_v27, %v503_v34  ;;  %v524_v36 = vmul.f32 0.5, %v516_v33 }
  0xb7   : > { %v523_v37 = vmul.f32 0.5, %v515_v35  ;;  %v2755_v39 = vpop.eup %2754 }
  0xb8   : > { %v485_v38 = vpop.f32.mrf.mxu3  ;;  %v538_v45 = vadd.f32 1.0, %v2755_v39  ;;  %v2649_v39 = vld [vmem:[#allocation8 + $0x6c] sm:$0xf] }
  0xb9   : > { %2756 = vtanh.f32 %v523_v37  ;;  %v505_v40 = vmul.f32 %v3299_v24, %v485_v38  ;;  %v2583_v38 = vld [vmem:[#allocation8 + $0x98] sm:$0xf0] }
  0xba   : > { %2758 = vtanh.f32 %v524_v36  ;;  %v546_v50 = vmul.f32 %v538_v45, %v522_v29  ;;  %v2533_v45 = vld [vmem:[#allocation8 + $0x18] sm:$0xf] }
  0xbb   : > { %v517_v43 = vadd.f32 %v3302_v27, %v505_v40 }
  0xbd   : > { %v525_v46 = vmul.f32 0.5, %v517_v43  ;;  %v2581_v43 = vld [vmem:[#allocation8 + $0x70] sm:$0xf] }
  0xbf   : > { %v2757_v47 = vpop.eup %2756  ;;  %2760 = vtanh.f32 %v525_v46 }
  0xc0   : > { %v539_v51 = vadd.f32 1.0, %v2757_v47  ;;  %v488_v52 = vpop.f32.mrf.mxu3  ;;  %v2759_v55 = vpop.eup %2758 }
  0xc1   : > { %v506_v56 = vmul.f32 %v3299_v24, %v488_v52  ;;  %v540_v61 = vadd.f32 1.0, %v2759_v55  ;;  %v2640_v55 = vld [vmem:[#allocation8 + $0x24] sm:$0xf] }
  0xc2   : > { %v547_v58 = vmul.f32 %v539_v51, %v523_v37  ;;  %v2650_v37 = vld [vmem:[#allocation8 + $0x74] sm:$0xf] }
  0xc3   : > { %v518_v59 = vadd.f32 %v3302_v27, %v506_v56  ;;  %v548_v5 = vmul.f32 %v540_v61, %v524_v36  ;;  %v2586_v41 = vor.u32 %v2650_v37, %v2583_v38  ;;  %v2543_v56 = vld [vmem:[#allocation8 + $0x48] sm:$0xf0]  ;;  %v2645_v61 = vld [vmem:[#allocation8 + $0x44] sm:$0xf0] }
  0xc4   : > { %v3313_v62 = vpack.c.bf16 %v547_v58, %v546_v50  ;;  %v2546_v58 = vor.u32 %v2640_v55, %v2543_v56 }
  0xc5   : > { %v2761_v1 = vpop.eup %2760  ;;  %v526_v3 = vmul.f32 0.5, %v518_v59  ;;  %v2535_v59 = vld [vmem:[#allocation8 + $0x40] sm:$0xf0] }
  0xc6   : > { %v541_v2 = vadd.f32 1.0, %v2761_v1  ;;  %2587 = vmatmul.msk.bf16.vlgmr.msrb.gmra.mxu0 %vm456_vm0, %v3313_v62  ;;  %2595 = vmatmul.msk.bf16.vlgmr.msrb.gmra.mxu3 %vm456_vm0, %v3313_v62  ;;  %v2538_v63 = vor.u32 %v2639_v57, %v2535_v59 }
  0xc7   : > { %783 = vmatpush.bf16.msrb.mxu0 %v2562_v60  ;;  %2762 = vtanh.f32 %v526_v3  ;;  %v2541_v60 = vld [vmem:[#allocation8 + $0x20] sm:$0xf] }
  0xc8   : > { %v549_v6 = vmul.f32 %v541_v2, %v525_v46  ;;  %v490_v7 = vpop.f32.mrf.mxu3  ;;  %v2582_v46 = vor.u32 %v2655_v44, %v2581_v43  ;;  %v2542_v0 = vor.u32 %v2645_v61, %v2541_v60  ;;  %v3393_v2 = vld [vmem:[#allocation10] sm:$0xff] }
  0xc9   : > { %v507_v8 = vmul.f32 %v3299_v24, %v490_v7 }
  0xca   : > { %v3320_v9 = vpack.c.bf16 %v549_v6, %v548_v5  ;;  %v3398_v5 = vld [vmem:[#allocation11] sm:$0xff] }
  0xcb   : > { %v519_v13 = vadd.f32 %v3302_v27, %v507_v8  ;;  %784 = vmatpush.bf16.msrb.mxu0 %v2522_v4  ;;  %v3396_v4 = vperm.slane %v3393_v2, 0  ;;  %v3408_v7 = vperm.slane %v3398_v5, 0  ;;  %v3412_v10 = vperm.slane %v3398_v5, 1 }
  0xcc   : > { %2588 = vmatmul.msk.bf16.vlgmr.msra.gmra.mxu1 %vm456_vm0, %v3320_v9  ;;  %2592 = vmatmul.msk.bf16.vlgmr.msra.gmra.mxu2 %vm456_vm0, %v3320_v9 }
  0xcd   : > { %v527_v17 = vmul.f32 0.5, %v519_v13  ;;  %v2763_v19 = vpop.eup %2762  ;;  %957 = vmatpush.bf16.msra.mxu2 %v2586_v41  ;;  %928 = vmatpush.bf16.msra.mxu1 %v2582_v46 }
  0xce   : > { %v542_v22 = vadd.f32 1.0, %v2763_v19 }
  0xcf   : > { %2764 = vtanh.f32 %v527_v17 }
  0xd0   : > { %v493_v18 = vpop.f32.mrf.mxu3  ;;  %v550_v31 = vmul.f32 %v542_v22, %v526_v3 }
  0xd1   : > { %v508_v20 = vmul.f32 %v3299_v24, %v493_v18  ;;  %958 = vmatpush.bf16.msra.mxu2 %v2546_v58  ;;  %929 = vmatpush.bf16.msra.mxu1 %v2542_v0 }
  0xd3   : > { %v520_v21 = vadd.f32 %v3302_v27, %v508_v20 }
  0xd5   : > { %v2765_v23 = vpop.eup %2764  ;;  %v528_v29 = vmul.f32 0.5, %v520_v21 }
  0xd6   : > { %v543_v25 = vadd.f32 1.0, %v2765_v23  ;;  %2591 = vmatmul.msk.bf16.vlgmr.msra.gmra.mxu0 %vm456_vm0, %v3313_v62  ;;  %2596 = vmatmul.msk.bf16.gmra.mxu3 %vm456_vm0, %v3320_v9 }
  0xd7   : > { %2766 = vtanh.f32 %v528_v29 }
  0xd8   : > { %v551_v32 = vmul.f32 %v543_v25, %v527_v17  ;;  %v495_v33 = vpop.f32.mrf.mxu3 }
  0xd9   : > { %v509_v34 = vmul.f32 %v3299_v24, %v495_v33  ;;  %v2578_v24 = vor.u32 %v2649_v39, %v2575_v42  ;;  %v3430_v39 = vperm.slane %v3393_v2, 2 }
  0xda   : > { %v3334_v35 = vpack.c.bf16 %v551_v32, %v550_v31 }
  0xdb   : > { %v521_v36 = vadd.f32 %v3302_v27, %v509_v34  ;;  %v2644_v27 = vld [vmem:[#allocation8 + $0x3c] sm:$0xf0]  ;;  %899 = vmatpush.bf16.msra.mxu0 %v2578_v24 }
  0xdc   : > { %2589 = vmatmul.msk.bf16.gmra.mxu1 %vm456_vm0, %v3334_v35  ;;  %2593 = vmatmul.msk.bf16.gmra.mxu2 %vm456_vm0, %v3334_v35  ;;  %v2534_v47 = vor.u32 %v2644_v27, %v2533_v45  ;;  %v3440_v45 = vperm.slane %v3398_v5, 2 }
  0xdd   : > { %v529_v40 = vmul.f32 0.5, %v521_v36  ;;  %v2767_v48 = vpop.eup %2766 }
  0xde   : > { %871 = vmatpush.bf16.msra.mxu3 %v2534_v47  ;;  %v544_v49 = vadd.f32 1.0, %v2767_v48  ;;  %v3444_v47 = vperm.slane %v3393_v2, 3 }
  0xdf   : > { %2768 = vtanh.f32 %v529_v40  ;;  %900 = vmatpush.bf16.msra.mxu0 %v2538_v63 }
  0xe0   : > { %v552_v52 = vmul.f32 %v544_v49, %v528_v29 }
  0xe5   : > { %v2769_v50 = vpop.eup %2768 }
  0xe6   : > { %v545_v51 = vadd.f32 1.0, %v2769_v50  ;;  %2597 = vmatmul.msk.bf16.gmra.mxu3 %vm456_vm0, %v3334_v35  ;;  %2599 = vmatmul.msk.bf16.vlgmr.msrb.gmra.mxu0 %vm456_vm0, %v3313_v62 }
  0xe8   : > { %v553_v53 = vmul.f32 %v545_v51, %v529_v40 }
  0xea   : > { %v3345_v54 = vpack.c.bf16 %v553_v53, %v552_v52 }
  0xec   : > { %2590 = vmatmul.msk.bf16.gmra.mxu1 %vm456_vm0, %v3345_v54  ;;  %2594 = vmatmul.msk.bf16.gmra.mxu2 %vm456_vm0, %v3345_v54 }
  0xf6   : > { %2598 = vmatmul.msk.bf16.gmra.mxu3 %vm456_vm0, %v3345_v54  ;;  %2600 = vmatmul.msk.bf16.gmra.mxu0 %vm456_vm0, %v3320_v9 }
  0xfc   : > { %2603 = vmatmul.msk.bf16.vlgmr.msrb.gmra.mxu1 %vm456_vm0, %v3313_v62  ;;  %2607 = vmatmul.msk.bf16.vlgmr.msrb.gmra.mxu2 %vm456_vm0, %v3313_v62 }
 0x106   : > { %2601 = vmatmul.msk.bf16.gmra.mxu0 %vm456_vm0, %v3334_v35  ;;  %2611 = vmatmul.msk.bf16.vlgmr.msra.gmra.mxu3 %vm456_vm0, %v3313_v62 }
 0x10c   : > { %2604 = vmatmul.msk.bf16.gmra.mxu1 %vm456_vm0, %v3320_v9  ;;  %2608 = vmatmul.msk.bf16.gmra.mxu2 %vm456_vm0, %v3320_v9 }
 0x116   : > { %2602 = vmatmul.msk.bf16.gmra.mxu0 %vm456_vm0, %v3345_v54  ;;  %2612 = vmatmul.msk.bf16.gmra.mxu3 %vm456_vm0, %v3320_v9 }
 0x11c   : > { %2605 = vmatmul.msk.bf16.gmra.mxu1 %vm456_vm0, %v3334_v35  ;;  %2609 = vmatmul.msk.bf16.gmra.mxu2 %vm456_vm0, %v3334_v35 }
 0x126   : > { %2613 = vmatmul.msk.bf16.gmra.mxu3 %vm456_vm0, %v3334_v35  ;;  %2615 = vmatmul.msk.bf16.vlgmr.msra.gmra.mxu0 %vm456_vm0, %v3313_v62 }
 0x12c   : > { %2606 = vmatmul.msk.bf16.gmra.mxu1 %vm456_vm0, %v3345_v54  ;;  %2610 = vmatmul.msk.bf16.gmra.mxu2 %vm456_vm0, %v3345_v54 }
 0x136   : > { %2614 = vmatmul.msk.bf16.gmra.mxu3 %vm456_vm0, %v3345_v54  ;;  %2616 = vmatmul.msk.bf16.gmra.mxu0 %vm456_vm0, %v3320_v9 }
 0x13c   : > { %2619 = vmatmul.msk.bf16.vlgmr.msra.gmra.mxu1 %vm456_vm0, %v3313_v62  ;;  %2623 = vmatmul.msk.bf16.vlgmr.msra.gmra.mxu2 %vm456_vm0, %v3313_v62  ;;  %v3405_v62 = vperm.slane %v3393_v2, 1 }
 0x143   : > { %v699_v1 = vpop.f32.mrf.mxu0 }
 0x144   : > { %v1004_v14 = vmul.f32 %v3396_v4, %v699_v1 }
 0x146   : > { %2617 = vmatmul.msk.bf16.gmra.mxu0 %vm456_vm0, %v3334_v35  ;;  %v1108_v19 = vadd.f32 %v3408_v7, %v1004_v14 }
 0x149   : > { %v704_v3 = vpop.f32.mrf.mxu1  ;;  %v757_v23 = vpop.f32.mrf.mxu3 }
 0x14a   : > { %v1024_v8 = vmul.f32 %v3396_v4, %v704_v3  ;;  %v1006_v55 = vmul.f32 %v3430_v39, %v757_v23  ;;  %v3464_v3 = vperm.slane %v3398_v5, 3 }
 0x14b   : > { %v701_v6 = vpop.f32.mrf.mxu0 }
 0x14c   : > { %2620 = vmatmul.msk.bf16.gmra.mxu1 %vm456_vm0, %v3320_v9  ;;  %2624 = vmatmul.msk.bf16.gmra.mxu2 %vm456_vm0, %v3320_v9  ;;  %v1128_v15 = vadd.f32 %v3408_v7, %v1024_v8  ;;  %v1014_v32 = vmul.f32 %v3396_v4, %v701_v6  ;;  %v1110_v14 = vadd.f32 %v3440_v45, %v1006_v55 }
 0x14e   : > { %v1118_v48 = vadd.f32 %v3408_v7, %v1014_v32 }
 0x14f   : > { %v733_v11 = vpop.f32.mrf.mxu2 }
 0x150   : > { %v1025_v12 = vmul.f32 %v3405_v62, %v733_v11 }
 0x151   : > { %v706_v13 = vpop.f32.mrf.mxu1  ;;  %v759_v59 = vpop.f32.mrf.mxu3 }
 0x152   : > { %v1129_v9 = vadd.f32 %v3412_v10, %v1025_v12  ;;  %v1034_v25 = vmul.f32 %v3396_v4, %v706_v13 }
 0x153   : > { %v728_v16 = vpop.f32.mrf.mxu0 }
 0x154   : > { %v1198_v17 = vpack.c.bf16 %v1129_v9, %v1128_v15  ;;  %v1005_v18 = vmul.f32 %v3405_v62, %v728_v16  ;;  %v1138_v40 = vadd.f32 %v3408_v7, %v1034_v25 }
 0x156   : > { %v1248_v20 = vunpack.c.l.bf16 %v1198_v17  ;;  %v1249_v21 = vunpack.c.h.bf16 %v1198_v17  ;;  %v1109_v22 = vadd.f32 %v3412_v10, %v1005_v18  ;;  %2618 = vmatmul.msk.bf16.gmra.mxu0 %vm456_vm0, %v3345_v54 }
 0x157   : > { %v735_v26 = vpop.f32.mrf.mxu2 }
 0x158   : > { %v1328_v28 = vmul.f32 0.5, %v1248_v20  ;;  %v1329_v29 = vmul.f32 0.5, %v1249_v21  ;;  %v1188_v30 = vpack.c.bf16 %v1109_v22, %v1108_v19  ;;  %v1035_v31 = vmul.f32 %v3405_v62, %v735_v26 }
 0x159   : > { %v709_v38 = vpop.f32.mrf.mxu1 }
 0x15a   : > { %v3426_v33 = vpack.c.bf16 %v1329_v29, %v1328_v28  ;;  %v1228_v34 = vunpack.c.l.bf16 %v1188_v30  ;;  %v1229_v36 = vunpack.c.h.bf16 %v1188_v30  ;;  %v1139_v37 = vadd.f32 %v3412_v10, %v1035_v31 }
 0x15b   : > { %v730_v41 = vpop.f32.mrf.mxu0  ;;  %v1044_v50 = vmul.f32 %v3396_v4, %v709_v38  ;;  %v1016_v28 = vmul.f32 %v3430_v39, %v759_v59 }
 0x15c   : > { %v1448_v42 = vunpack.c.l.bf16 %v3426_v33  ;;  %v1449_v43 = vunpack.c.h.bf16 %v3426_v33  ;;  %v1308_v24 = vmul.f32 0.5, %v1228_v34  ;;  %v1309_v44 = vmul.f32 0.5, %v1229_v36  ;;  %2621 = vmatmul.msk.bf16.gmra.mxu1 %vm456_vm0, %v3334_v35  ;;  %2625 = vmatmul.msk.bf16.gmra.mxu2 %vm456_vm0, %v3334_v35 }
 0x15d   : > { %v1203_v46 = vpack.c.bf16 %v1139_v37, %v1138_v40  ;;  %v1015_v27 = vmul.f32 %v3405_v62, %v730_v41  ;;  %v1148_v0 = vadd.f32 %v3408_v7, %v1044_v50 }
 0x15e   : > { %2770 = vtanh.f32 %v1448_v42  ;;  %v3449_v49 = vpack.c.bf16 %v1309_v44, %v1308_v24 }
 0x15f   : > { %2772 = vtanh.f32 %v1449_v43  ;;  %v1258_v35 = vunpack.c.l.bf16 %v1203_v46  ;;  %v1259_v51 = vunpack.c.h.bf16 %v1203_v46  ;;  %v1119_v52 = vadd.f32 %v3412_v10, %v1015_v27  ;;  %v738_v53 = vpop.f32.mrf.mxu2 }
 0x160   : > { %v1428_v56 = vunpack.c.l.bf16 %v3449_v49  ;;  %v1429_v57 = vunpack.c.h.bf16 %v3449_v49  ;;  %v1045_v58 = vmul.f32 %v3405_v62, %v738_v53 }
 0x161   : > { %v1338_v60 = vmul.f32 0.5, %v1258_v35  ;;  %v1339_v61 = vmul.f32 0.5, %v1259_v51  ;;  %v1193_v63 = vpack.c.bf16 %v1119_v52, %v1118_v48  ;;  %v711_v9 = vpop.f32.mrf.mxu1  ;;  %v762_v35 = vpop.f32.mrf.mxu3 }
 0x162   : > { %2774 = vtanh.f32 %v1428_v56  ;;  %v1149_v1 = vadd.f32 %v3412_v10, %v1045_v58  ;;  %v1054_v30 = vmul.f32 %v3396_v4, %v711_v9 }
 0x163   : > { %2776 = vtanh.f32 %v1429_v57  ;;  %v3468_v6 = vpack.c.bf16 %v1339_v61, %v1338_v60  ;;  %v1238_v8 = vunpack.c.l.bf16 %v1193_v63  ;;  %v1239_v11 = vunpack.c.h.bf16 %v1193_v63  ;;  %v786_v12 = vpop.f32.mrf.mxu0 }
 0x164   : > { %v2771_v13 = vpop.eup %2770  ;;  %v1208_v15 = vpack.c.bf16 %v1149_v1, %v1148_v0  ;;  %v1007_v16 = vmul.f32 %v3444_v47, %v786_v12 }
 0x165   : > { %v2773_v17 = vpop.eup %2772  ;;  %v1458_v18 = vunpack.c.l.bf16 %v3468_v6  ;;  %v1459_v19 = vunpack.c.h.bf16 %v3468_v6  ;;  %v1318_v20 = vmul.f32 0.5, %v1238_v8  ;;  %v1319_v21 = vmul.f32 0.5, %v1239_v11 }
 0x166   : > { %v1598_v22 = vpack.c.bf16 %v2773_v17, %v2771_v13  ;;  %v1268_v23 = vunpack.c.l.bf16 %v1208_v15  ;;  %v1269_v25 = vunpack.c.h.bf16 %v1208_v15  ;;  %v1111_v26 = vadd.f32 %v3464_v3, %v1007_v16 }
 0x167   : > { %2778 = vtanh.f32 %v1458_v18  ;;  %v3478_v29 = vpack.c.bf16 %v1319_v21, %v1318_v20  ;;  %v740_v31 = vpop.f32.mrf.mxu2  ;;  %v1158_v20 = vadd.f32 %v3408_v7, %v1054_v30  ;;  %v3515_v30 = vadd.f32 %v3440_v45, %v1016_v28 }
 0x168   : > { %v2775_v32 = vpop.eup %2774  ;;  %v1648_v34 = vunpack.c.l.bf16 %v1598_v22  ;;  %v1649_v36 = vunpack.c.h.bf16 %v1598_v22  ;;  %2780 = vtanh.f32 %v1459_v19  ;;  %v1348_v37 = vmul.f32 0.5, %v1268_v23 }
 0x169   : > { %v2777_v38 = vpop.eup %2776  ;;  %v1438_v40 = vunpack.c.l.bf16 %v3478_v29  ;;  %v1439_v41 = vunpack.c.h.bf16 %v3478_v29  ;;  %v1349_v24 = vmul.f32 0.5, %v1269_v25  ;;  %v1189_v44 = vpack.c.bf16 %v1111_v26, %v1110_v14 }
 0x16a   : > { %v1728_v46 = vadd.f32 1.0, %v1648_v34  ;;  %v1729_v27 = vadd.f32 1.0, %v1649_v36  ;;  %v1588_v48 = vpack.c.bf16 %v2777_v38, %v2775_v32  ;;  %v1055_v50 = vmul.f32 %v3405_v62, %v740_v31 }
 0x16b   : > { %2782 = vtanh.f32 %v1438_v40  ;;  %v3488_v51 = vpack.c.bf16 %v1349_v24, %v1348_v37  ;;  %v1230_v52 = vunpack.c.l.bf16 %v1189_v44  ;;  %v1231_v53 = vunpack.c.h.bf16 %v1189_v44 }
 0x16c   : > { %v1798_v55 = vpack.c.bf16 %v1729_v27, %v1728_v46  ;;  %v1628_v58 = vunpack.c.l.bf16 %v1588_v48  ;;  %v1629_v59 = vunpack.c.h.bf16 %v1588_v48  ;;  %2784 = vtanh.f32 %v1439_v41  ;;  %2622 = vmatmul.msk.bf16.gmra.mxu1 %vm456_vm0, %v3345_v54  ;;  %2626 = vmatmul.msk.bf16.gmra.mxu2 %vm456_vm0, %v3345_v54 }
 0x16d   : > { %v2779_v60 = vpop.eup %2778  ;;  %v1468_v61 = vunpack.c.l.bf16 %v3488_v51  ;;  %v1469_v63 = vunpack.c.h.bf16 %v3488_v51  ;;  %v1310_v0 = vmul.f32 0.5, %v1230_v52  ;;  %v1311_v1 = vmul.f32 0.5, %v1231_v53 }
 0x16e   : > { %v2781_v8 = vpop.eup %2780  ;;  %v1848_v11 = vunpack.c.l.bf16 %v1798_v55  ;;  %v1849_v12 = vunpack.c.h.bf16 %v1798_v55  ;;  %v1708_v13 = vadd.f32 1.0, %v1628_v58  ;;  %v1709_v14 = vadd.f32 1.0, %v1629_v59 }
 0x16f   : > { %v1603_v15 = vpack.c.bf16 %v2781_v8, %v2779_v60  ;;  %2786 = vtanh.f32 %v1468_v61  ;;  %v3500_v9 = vpack.c.bf16 %v1311_v1, %v1310_v0  ;;  %v1159_v54 = vadd.f32 %v3412_v10, %v1055_v50  ;;  %v764_v50 = vpop.f32.mrf.mxu3 }
 0x170   : > { %v1928_v16 = vmul.f32 %v1848_v11, %v1448_v42  ;;  %v1788_v17 = vpack.c.bf16 %v1709_v14, %v1708_v13  ;;  %2788 = vtanh.f32 %v1469_v63  ;;  %v1929_v32 = vmul.f32 %v1849_v12, %v1449_v43  ;;  %v714_v11 = vpop.f32.mrf.mxu1 }
 0x171   : > { %v2783_v21 = vpop.eup %2782  ;;  %v1658_v22 = vunpack.c.l.bf16 %v1603_v15  ;;  %v1659_v23 = vunpack.c.h.bf16 %v1603_v15  ;;  %v1430_v25 = vunpack.c.l.bf16 %v3500_v9  ;;  %v1431_v26 = vunpack.c.h.bf16 %v3500_v9 }
 0x172   : > { %v2785_v31 = vpop.eup %2784  ;;  %v1828_v34 = vunpack.c.l.bf16 %v1788_v17  ;;  %v1829_v36 = vunpack.c.h.bf16 %v1788_v17  ;;  %v1213_v42 = vpack.c.bf16 %v1159_v54, %v1158_v20  ;;  %v3523_v53 = vpack.c.bf16 %v1929_v32, %v1928_v16 }
 0x173   : > { %v1738_v37 = vadd.f32 1.0, %v1658_v22  ;;  %v1739_v38 = vadd.f32 1.0, %v1659_v23  ;;  %v1593_v24 = vpack.c.bf16 %v2785_v31, %v2783_v21  ;;  %2790 = vtanh.f32 %v1430_v25 }
 0x174   : > { %v1908_v44 = vmul.f32 %v1828_v34, %v1428_v56  ;;  %v1909_v46 = vmul.f32 %v1829_v36, %v1429_v57  ;;  %2792 = vtanh.f32 %v1431_v26  ;;  %v3526_v28 = vmul.f32 %v3430_v39, %v762_v35  ;;  %v788_v34 = vpop.f32.mrf.mxu0 }
 0x175   : > { %v2787_v33 = vpop.eup %2786  ;;  %v1803_v43 = vpack.c.bf16 %v1739_v38, %v1738_v37  ;;  %v1638_v27 = vunpack.c.l.bf16 %v1593_v24  ;;  %v1639_v48 = vunpack.c.h.bf16 %v1593_v24  ;;  %v1278_v55 = vunpack.c.l.bf16 %v1213_v42 }
 0x176   : > { %v2789_v52 = vpop.eup %2788  ;;  %v1279_v58 = vunpack.c.h.bf16 %v1213_v42  ;;  %v1988_v60 = vpack.c.bf16 %v1909_v46, %v1908_v44  ;;  %v3529_v1 = vmul.f32 %v3430_v39, %v764_v50  ;;  %v2058_v54 = vunpack.c.l.bf16 %v3523_v53  ;;  %v743_v42 = vpop.f32.mrf.mxu2 }
 0x177   : > { %v1858_v56 = vunpack.c.l.bf16 %v1803_v43  ;;  %v1859_v59 = vunpack.c.h.bf16 %v1803_v43  ;;  %v1718_v49 = vadd.f32 1.0, %v1638_v27  ;;  %v1719_v57 = vadd.f32 1.0, %v1639_v48 }
 0x178   : > { %v1608_v0 = vpack.c.bf16 %v2789_v52, %v2787_v33  ;;  %v1358_v8 = vmul.f32 0.5, %v1278_v55  ;;  %v1359_v15 = vmul.f32 0.5, %v1279_v58  ;;  %v2059_v16 = vunpack.c.h.bf16 %v3523_v53 }
 0x179   : > { %v2791_v12 = vpop.eup %2790  ;;  %v1938_v13 = vmul.f32 %v1858_v56, %v1458_v18  ;;  %v1939_v35 = vmul.f32 %v1859_v59, %v1459_v19  ;;  %v1793_v14 = vpack.c.bf16 %v1719_v57, %v1718_v49  ;;  %v1064_v32 = vmul.f32 %v3396_v4, %v714_v11 }
 0x17a   : > { %v1668_v17 = vunpack.c.l.bf16 %v1608_v0  ;;  %v1669_v20 = vunpack.c.h.bf16 %v1608_v0  ;;  %v2793_v21 = vpop.eup %2792  ;;  %v3537_v31 = vpack.c.bf16 %v1359_v15, %v1358_v8  ;;  %v2038_v18 = vunpack.c.l.bf16 %v1988_v60 }
 0x17b   : > { %v1838_v22 = vunpack.c.l.bf16 %v1793_v14  ;;  %v1839_v23 = vunpack.c.h.bf16 %v1793_v14  ;;  %v1589_v19 = vpack.c.bf16 %v2793_v21, %v2791_v12  ;;  %v2039_v37 = vunpack.c.h.bf16 %v1988_v60 }
 0x17c   : > { %v1748_v36 = vadd.f32 1.0, %v1668_v17  ;;  %v1749_v6 = vadd.f32 1.0, %v1669_v20  ;;  %v2003_v38 = vpack.c.bf16 %v1939_v35, %v1938_v13  ;;  %v1478_v27 = vunpack.c.l.bf16 %v3537_v31  ;;  %v716_v17 = vpop.f32.mrf.mxu1  ;;  %v791_v21 = vpop.f32.mrf.mxu0 }
 0x17d   : > { %v1918_v24 = vmul.f32 %v1838_v22, %v1438_v40  ;;  %v1919_v44 = vmul.f32 %v1839_v23, %v1439_v41  ;;  %v1630_v33 = vunpack.c.l.bf16 %v1589_v19  ;;  %v1631_v43 = vunpack.c.h.bf16 %v1589_v19 }
 0x17e   : > { %v1808_v46 = vpack.c.bf16 %v1749_v6, %v1748_v36  ;;  %v1479_v50 = vunpack.c.h.bf16 %v3537_v31  ;;  %v1017_v52 = vmul.f32 %v3444_v47, %v788_v34  ;;  %v1065_v53 = vmul.f32 %v3405_v62, %v743_v42 }
 0x17f   : > { %v1993_v48 = vpack.c.bf16 %v1919_v44, %v1918_v24  ;;  %v1710_v56 = vadd.f32 1.0, %v1630_v33  ;;  %v1711_v59 = vadd.f32 1.0, %v1631_v43  ;;  %2794 = vtanh.f32 %v1478_v27  ;;  %v767_v33 = vpop.f32.mrf.mxu3 }
 0x180   : > { %v1868_v55 = vunpack.c.l.bf16 %v1808_v46  ;;  %v1869_v58 = vunpack.c.h.bf16 %v1808_v46  ;;  %v1121_v29 = vadd.f32 %v3464_v3, %v1017_v52  ;;  %2796 = vtanh.f32 %v1479_v50 }
 0x181   : > { %v2048_v40 = vunpack.c.l.bf16 %v1993_v48  ;;  %v2049_v49 = vunpack.c.h.bf16 %v1993_v48  ;;  %v1789_v60 = vpack.c.bf16 %v1711_v59, %v1710_v56  ;;  %v1168_v11 = vadd.f32 %v3408_v7, %v1064_v32 }
 0x182   : > { %v1948_v41 = vmul.f32 %v1868_v55, %v1468_v61  ;;  %v1949_v57 = vmul.f32 %v1869_v58, %v1469_v63  ;;  %v1194_v12 = vpack.c.bf16 %v1121_v29, %v3515_v30  ;;  %v2068_v13 = vunpack.c.l.bf16 %v2003_v38 }
 0x183   : > { %v2118_v0 = vadd.f32 %v2048_v40, %v2038_v18  ;;  %v2125_v8 = vadd.f32 %v2049_v49, %v2039_v37  ;;  %v2069_v35 = vunpack.c.h.bf16 %v2003_v38  ;;  %v1169_v15 = vadd.f32 %v3412_v10, %v1065_v53  ;;  %v745_v53 = vpop.f32.mrf.mxu2 }
 0x184   : > { %v2008_v14 = vpack.c.bf16 %v1949_v57, %v1948_v41  ;;  %v1240_v51 = vunpack.c.l.bf16 %v1194_v12  ;;  %v1241_v63 = vunpack.c.h.bf16 %v1194_v12  ;;  %v1830_v34 = vunpack.c.l.bf16 %v1789_v60 }
 0x185   : > { %v2119_v61 = vadd.f32 %v2118_v0, %v2058_v54  ;;  %v2126_v20 = vadd.f32 %v2125_v8, %v2059_v16  ;;  %v1831_v18 = vunpack.c.h.bf16 %v1789_v60  ;;  %v2795_v36 = vpop.eup %2794  ;;  %v1130_v37 = vadd.f32 %v3440_v45, %v3526_v28  ;;  %v815_v0 = vpop.f32.mrf.mxu1 }
 0x186   : > { %v2078_v22 = vunpack.c.l.bf16 %v2008_v14  ;;  %v2079_v23 = vunpack.c.h.bf16 %v2008_v14  ;;  %v1320_v19 = vmul.f32 0.5, %v1240_v51  ;;  %v1321_v30 = vmul.f32 0.5, %v1241_v63  ;;  %v2797_v42 = vpop.eup %2796 }
 0x187   : > { %v2120_v6 = vadd.f32 %v2119_v61, %v2068_v13  ;;  %v2127_v32 = vadd.f32 %v2126_v20, %v2069_v35  ;;  %v3564_v54 = vadd.f32 %v3440_v45, %v3529_v1  ;;  %v1218_v16 = vpack.c.bf16 %v1169_v15, %v1168_v11  ;;  %v793_v35 = vpop.f32.mrf.mxu0 }
 0x188   : > { %v1074_v38 = vmul.f32 %v3396_v4, %v716_v17  ;;  %v1613_v46 = vpack.c.bf16 %v2797_v42, %v2795_v36  ;;  %v3571_v43 = vpack.c.bf16 %v1321_v30, %v1320_v19  ;;  %v1910_v48 = vmul.f32 %v1830_v34, %v1430_v25 }
 0x189   : > { %v3567_v24 = vadd.f32 %v2120_v6, %v2078_v22  ;;  %v3569_v44 = vadd.f32 %v2127_v32, %v2079_v23  ;;  %v1911_v28 = vmul.f32 %v1831_v18, %v1431_v26  ;;  %v1288_v52 = vunpack.c.l.bf16 %v1218_v16 }
 0x18a   : > { %v1289_v1 = vunpack.c.h.bf16 %v1218_v16  ;;  %v1678_v55 = vunpack.c.l.bf16 %v1613_v46  ;;  %v1679_v58 = vunpack.c.h.bf16 %v1613_v46  ;;  %v1440_v4 = vunpack.c.l.bf16 %v3571_v43 }
 0x18b   : > { %v1441_v56 = vunpack.c.h.bf16 %v3571_v43  ;;  %v3580_v59 = vmul.f32 %v3430_v39, %v767_v33  ;;  %v1368_v40 = vmul.f32 0.5, %v1288_v52  ;;  %v1027_v29 = vmul.f32 %v3444_v47, %v791_v21 }
 0x18c   : > { %v1369_v49 = vmul.f32 0.5, %v1289_v1  ;;  %v1758_v25 = vadd.f32 1.0, %v1678_v55  ;;  %v1759_v41 = vadd.f32 1.0, %v1679_v58  ;;  %2798 = vtanh.f32 %v1440_v4 }
 0x18d   : > { %v1075_v9 = vmul.f32 %v3405_v62, %v745_v53  ;;  %v3586_v26 = vpack.c.bf16 %v1911_v28, %v1910_v48  ;;  %2800 = vtanh.f32 %v1441_v56  ;;  %v1131_v60 = vadd.f32 %v3464_v3, %v1027_v29 }
 0x18e   : > { %v3590_v57 = vpack.c.bf16 %v1369_v49, %v1368_v40  ;;  %v1813_v8 = vpack.c.bf16 %v1759_v41, %v1758_v25  ;;  %v1178_v11 = vadd.f32 %v3408_v7, %v1074_v38  ;;  %v3596_v13 = vperm.slane %v3393_v2, 4  ;;  %v844_v49 = vpop.f32.mrf.mxu2 }
 0x18f   : > { %v1179_v12 = vadd.f32 %v3412_v10, %v1075_v9  ;;  %v1199_v15 = vpack.c.bf16 %v1131_v60, %v1130_v37  ;;  %v3601_v17 = vperm.slane %v3398_v5, 4  ;;  %v1037_v21 = vmul.f32 %v3444_v47, %v793_v35 }
 0x190   : > { %v1488_v62 = vunpack.c.l.bf16 %v3590_v57  ;;  %v1489_v14 = vunpack.c.h.bf16 %v3590_v57  ;;  %v1878_v61 = vunpack.c.l.bf16 %v1813_v8  ;;  %v1879_v20 = vunpack.c.h.bf16 %v1813_v8 }
 0x191   : > { %v1223_v51 = vpack.c.bf16 %v1179_v12, %v1178_v11  ;;  %v1008_v63 = vmul.f32 %v3596_v13, %v815_v0  ;;  %v1250_v7 = vunpack.c.l.bf16 %v1199_v15  ;;  %v1251_v10 = vunpack.c.h.bf16 %v1199_v15 }
 0x192   : > { %2802 = vtanh.f32 %v1488_v62  ;;  %v2799_v22 = vpop.eup %2798  ;;  %v1958_v23 = vmul.f32 %v1878_v61, %v1478_v27  ;;  %v1959_v34 = vmul.f32 %v1879_v20, %v1479_v50  ;;  %v1141_v38 = vadd.f32 %v3464_v3, %v1037_v21  ;;  %v796_v21 = vpop.f32.mrf.mxu0 }
 0x193   : > { %2804 = vtanh.f32 %v1489_v14  ;;  %v1298_v18 = vunpack.c.l.bf16 %v1223_v51  ;;  %v2801_v36 = vpop.eup %2800  ;;  %v1330_v6 = vmul.f32 0.5, %v1250_v7  ;;  %v1331_v32 = vmul.f32 0.5, %v1251_v10  ;;  %v817_v10 = vpop.f32.mrf.mxu1 }
 0x194   : > { %v1299_v19 = vunpack.c.h.bf16 %v1223_v51  ;;  %v1112_v30 = vadd.f32 %v3601_v17, %v1008_v63  ;;  %v2013_v42 = vpack.c.bf16 %v1959_v34, %v1958_v23  ;;  %v1594_v37 = vpack.c.bf16 %v2801_v36, %v2799_v22 }
 0x195   : > { %v1378_v16 = vmul.f32 0.5, %v1298_v18  ;;  %v3615_v46 = vpack.c.bf16 %v1331_v32, %v1330_v6  ;;  %v3618_v31 = vperm.slane %v3393_v2, 5  ;;  %v3621_v50 = vperm.slane %v3398_v5, 5 }
 0x196   : > { %v1379_v27 = vmul.f32 0.5, %v1299_v19  ;;  %v2088_v33 = vunpack.c.l.bf16 %v2013_v42  ;;  %v2089_v48 = vunpack.c.h.bf16 %v2013_v42  ;;  %v1640_v28 = vunpack.c.l.bf16 %v1594_v37 }
 0x197   : > { %v1641_v52 = vunpack.c.h.bf16 %v1594_v37  ;;  %v1450_v53 = vunpack.c.l.bf16 %v3615_v46  ;;  %v1451_v55 = vunpack.c.h.bf16 %v3615_v46  ;;  %v1204_v40 = vpack.c.bf16 %v1141_v38, %v3564_v54 }
 0x198   : > { %v2803_v1 = vpop.eup %2802  ;;  %v3625_v58 = vpack.c.bf16 %v1379_v27, %v1378_v16  ;;  %v3629_v2 = vadd.f32 %v3567_v24, %v2088_v33  ;;  %v3632_v5 = vadd.f32 %v3569_v44, %v2089_v48  ;;  %v1720_v25 = vadd.f32 1.0, %v1640_v28  ;;  %v846_v48 = vpop.f32.mrf.mxu2 }
 0x199   : > { %v2805_v29 = vpop.eup %2804  ;;  %v1721_v41 = vadd.f32 1.0, %v1641_v52  ;;  %2806 = vtanh.f32 %v1450_v53  ;;  %v1260_v54 = vunpack.c.l.bf16 %v1204_v40  ;;  %v1261_v24 = vunpack.c.h.bf16 %v1204_v40 }
 0x19a   : > { %v1618_v9 = vpack.c.bf16 %v2805_v29, %v2803_v1  ;;  %v1498_v60 = vunpack.c.l.bf16 %v3625_v58  ;;  %v1499_v0 = vunpack.c.h.bf16 %v3625_v58  ;;  %2808 = vtanh.f32 %v1451_v55 }
 0x19b   : > { %v1794_v8 = vpack.c.bf16 %v1721_v41, %v1720_v25  ;;  %v1009_v44 = vmul.f32 %v3618_v31, %v844_v49  ;;  %v1340_v61 = vmul.f32 0.5, %v1260_v54  ;;  %v1341_v63 = vmul.f32 0.5, %v1261_v24 }
 0x19c   : > { %v1688_v11 = vunpack.c.l.bf16 %v1618_v9  ;;  %v1689_v12 = vunpack.c.h.bf16 %v1618_v9  ;;  %2810 = vtanh.f32 %v1498_v60  ;;  %v1150_v22 = vadd.f32 %v3440_v45, %v3580_v59 }
 0x19d   : > { %v1840_v35 = vunpack.c.l.bf16 %v1794_v8  ;;  %v1841_v15 = vunpack.c.h.bf16 %v1794_v8  ;;  %2812 = vtanh.f32 %v1499_v0  ;;  %v1113_v7 = vadd.f32 %v3621_v50, %v1009_v44 }
 0x19e   : > { %v1768_v20 = vadd.f32 1.0, %v1688_v11  ;;  %v1769_v51 = vadd.f32 1.0, %v1689_v12  ;;  %v2040_v36 = vunpack.c.l.bf16 %v3586_v26  ;;  %v3653_v32 = vpack.c.bf16 %v1341_v63, %v1340_v61 }
 0x19f   : > { %v1920_v23 = vmul.f32 %v1840_v35, %v1440_v4  ;;  %v1921_v34 = vmul.f32 %v1841_v15, %v1441_v56  ;;  %v2807_v18 = vpop.eup %2806  ;;  %v1190_v19 = vpack.c.bf16 %v1113_v7, %v1112_v30  ;;  %v2041_v37 = vunpack.c.h.bf16 %v3586_v26 }
 0x1a0   : > { %v1818_v6 = vpack.c.bf16 %v1769_v51, %v1768_v20  ;;  %v2809_v42 = vpop.eup %2808  ;;  %v1018_v38 = vmul.f32 %v3596_v13, %v817_v10  ;;  %v1047_v59 = vmul.f32 %v3444_v47, %v796_v21  ;;  %v1460_v56 = vunpack.c.l.bf16 %v3653_v32  ;;  %v769_v20 = vpop.f32.mrf.mxu3 }
 0x1a1   : > { %v1994_v16 = vpack.c.bf16 %v1921_v34, %v1920_v23  ;;  %v1599_v43 = vpack.c.bf16 %v2809_v42, %v2807_v18  ;;  %v1461_v30 = vunpack.c.h.bf16 %v3653_v32  ;;  %v1232_v40 = vunpack.c.l.bf16 %v1190_v19 }
 0x1a2   : > { %v2811_v27 = vpop.eup %2810  ;;  %v1888_v4 = vunpack.c.l.bf16 %v1818_v6  ;;  %v1889_v33 = vunpack.c.h.bf16 %v1818_v6  ;;  %v1019_v54 = vmul.f32 %v3618_v31, %v846_v48  ;;  %2814 = vtanh.f32 %v1460_v56 }
 0x1a3   : > { %v2813_v28 = vpop.eup %2812  ;;  %v2050_v52 = vunpack.c.l.bf16 %v1994_v16  ;;  %v2051_v1 = vunpack.c.h.bf16 %v1994_v16  ;;  %v1650_v29 = vunpack.c.l.bf16 %v1599_v43  ;;  %v1651_v25 = vunpack.c.h.bf16 %v1599_v43 }
 0x1a4   : > { %v1968_v26 = vmul.f32 %v1888_v4, %v1488_v62  ;;  %v1969_v49 = vmul.f32 %v1889_v33, %v1489_v14  ;;  %v1623_v8 = vpack.c.bf16 %v2813_v28, %v2811_v27  ;;  %2816 = vtanh.f32 %v1461_v30 }
 0x1a5   : > { %v2132_v41 = vadd.f32 %v2050_v52, %v2040_v36  ;;  %v2139_v9 = vadd.f32 %v2051_v1, %v2041_v37  ;;  %v1730_v11 = vadd.f32 1.0, %v1650_v29  ;;  %v1731_v12 = vadd.f32 1.0, %v1651_v25 }
 0x1a6   : > { %v2018_v24 = vpack.c.bf16 %v1969_v49, %v1968_v26  ;;  %v1698_v44 = vunpack.c.l.bf16 %v1623_v8  ;;  %v1699_v35 = vunpack.c.h.bf16 %v1623_v8  ;;  %v1233_v57 = vunpack.c.h.bf16 %v1190_v19 }
 0x1a7   : > { %v1799_v15 = vpack.c.bf16 %v1731_v12, %v1730_v11  ;;  %v1312_v61 = vmul.f32 0.5, %v1232_v40  ;;  %v1151_v10 = vadd.f32 %v3464_v3, %v1047_v59  ;;  %v1123_v42 = vadd.f32 %v3621_v50, %v1019_v54 }
 0x1a8   : > { %v2098_v62 = vunpack.c.l.bf16 %v2018_v24  ;;  %v2099_v14 = vunpack.c.h.bf16 %v2018_v24  ;;  %v1778_v51 = vadd.f32 1.0, %v1698_v44  ;;  %v1779_v63 = vadd.f32 1.0, %v1699_v35  ;;  %v2815_v37 = vpop.eup %2814 }
 0x1a9   : > { %v1313_v7 = vmul.f32 0.5, %v1233_v57  ;;  %v1850_v34 = vunpack.c.l.bf16 %v1799_v15  ;;  %v1851_v18 = vunpack.c.h.bf16 %v1799_v15  ;;  %v1209_v19 = vpack.c.bf16 %v1151_v10, %v1150_v22 }
 0x1aa   : > { %v2123_v21 = vadd.f32 %v3629_v2, %v2098_v62  ;;  %v2130_v23 = vadd.f32 %v3632_v5, %v2099_v14  ;;  %v1823_v36 = vpack.c.bf16 %v1779_v63, %v1778_v51  ;;  %v1056_v16 = vmul.f32 %v3430_v39, %v769_v20  ;;  %v2817_v5 = vpop.eup %2816 }
 0x1ab   : > { %v3672_v6 = vpack.c.bf16 %v1313_v7, %v1312_v61  ;;  %v1930_v27 = vmul.f32 %v1850_v34, %v1450_v53  ;;  %v1931_v59 = vmul.f32 %v1851_v18, %v1451_v55  ;;  %v1122_v2 = vadd.f32 %v3601_v17, %v1018_v38  ;;  %v820_v7 = vpop.f32.mrf.mxu1 }
 0x1ac   : > { %v1898_v4 = vunpack.c.l.bf16 %v1823_v36  ;;  %v1899_v33 = vunpack.c.h.bf16 %v1823_v36  ;;  %v1604_v28 = vpack.c.bf16 %v2817_v5, %v2815_v37  ;;  %v1270_v52 = vunpack.c.l.bf16 %v1209_v19 }
 0x1ad   : > { %v1432_v43 = vunpack.c.l.bf16 %v3672_v6  ;;  %v1433_v22 = vunpack.c.h.bf16 %v3672_v6  ;;  %v1999_v48 = vpack.c.bf16 %v1931_v59, %v1930_v27  ;;  %v1271_v1 = vunpack.c.h.bf16 %v1209_v19  ;;  %v798_v19 = vpop.f32.mrf.mxu0 }
 0x1ae   : > { %v1978_v40 = vmul.f32 %v1898_v4, %v1498_v60  ;;  %v1979_v46 = vmul.f32 %v1899_v33, %v1499_v0  ;;  %v1195_v53 = vpack.c.bf16 %v1123_v42, %v1122_v2  ;;  %v1660_v26 = vunpack.c.l.bf16 %v1604_v28 }
 0x1af   : > { %2818 = vtanh.f32 %v1432_v43  ;;  %v2060_v55 = vunpack.c.l.bf16 %v1999_v48  ;;  %v2061_v38 = vunpack.c.h.bf16 %v1999_v48  ;;  %v1661_v49 = vunpack.c.h.bf16 %v1604_v28 }
 0x1b0   : > { %v2023_v29 = vpack.c.bf16 %v1979_v46, %v1978_v40  ;;  %2820 = vtanh.f32 %v1433_v22  ;;  %v1350_v25 = vmul.f32 0.5, %v1270_v52  ;;  %v1351_v8 = vmul.f32 0.5, %v1271_v1  ;;  %v849_v46 = vpop.f32.mrf.mxu2 }
 0x1b1   : > { %v2133_v54 = vadd.f32 %v2132_v41, %v2060_v55  ;;  %v2140_v24 = vadd.f32 %v2139_v9, %v2061_v38  ;;  %v1740_v60 = vadd.f32 1.0, %v1660_v26  ;;  %v1741_v11 = vadd.f32 1.0, %v1661_v49  ;;  %v772_v26 = vpop.f32.mrf.mxu3 }
 0x1b2   : > { %v2108_v58 = vunpack.c.l.bf16 %v2023_v29  ;;  %v2109_v0 = vunpack.c.h.bf16 %v2023_v29  ;;  %v3691_v12 = vpack.c.bf16 %v1351_v8, %v1350_v25  ;;  %v1242_v44 = vunpack.c.l.bf16 %v1195_v53 }
 0x1b3   : > { %v1804_v35 = vpack.c.bf16 %v1741_v11, %v1740_v60  ;;  %v1243_v57 = vunpack.c.h.bf16 %v1195_v53  ;;  %v1160_v34 = vadd.f32 %v3440_v45, %v1056_v16  ;;  %v1028_v16 = vmul.f32 %v3596_v13, %v820_v7 }
 0x1b4   : > { %v2124_v14 = vadd.f32 %v2123_v21, %v2108_v58  ;;  %v2131_v15 = vadd.f32 %v2130_v23, %v2109_v0  ;;  %v1470_v61 = vunpack.c.l.bf16 %v3691_v12  ;;  %v1471_v20 = vunpack.c.h.bf16 %v3691_v12 }
 0x1b5   : > { %v2819_v62 = vpop.eup %2818  ;;  %v1860_v51 = vunpack.c.l.bf16 %v1804_v35  ;;  %v1861_v63 = vunpack.c.h.bf16 %v1804_v35  ;;  %v1322_v41 = vmul.f32 0.5, %v1242_v44  ;;  %v1323_v9 = vmul.f32 0.5, %v1243_v57 }
 0x1b6   : > { %v2821_v10 = vpop.eup %2820  ;;  %v2221_v18 = vrot.slane %v2124_v14, 4  ;;  %v2227_v36 = vrot.slane %v2131_v15, 4  ;;  %2822 = vtanh.f32 %v1470_v61  ;;  %v1057_v33 = vmul.f32 %v3444_v47, %v798_v19 }
 0x1b7   : > { %v1940_v21 = vmul.f32 %v1860_v51, %v1460_v56  ;;  %v1941_v23 = vmul.f32 %v1861_v63, %v1461_v30  ;;  %v1590_v42 = vpack.c.bf16 %v2821_v10, %v2819_v62  ;;  %2824 = vtanh.f32 %v1471_v20  ;;  %v822_v51 = vpop.f32.mrf.mxu1 }
 0x1b8   : > { %v2222_v37 = vadd.f32 %v2221_v18, %v2124_v14  ;;  %v2228_v27 = vadd.f32 %v2227_v36, %v2131_v15  ;;  %v3704_v59 = vpack.c.bf16 %v1323_v9, %v1322_v41  ;;  %v1161_v49 = vadd.f32 %v3464_v3, %v1057_v33  ;;  %v801_v33 = vpop.f32.mrf.mxu0 }
 0x1b9   : > { %v2004_v2 = vpack.c.bf16 %v1941_v23, %v1940_v21  ;;  %v1632_v5 = vunpack.c.l.bf16 %v1590_v42  ;;  %v1633_v4 = vunpack.c.h.bf16 %v1590_v42  ;;  %v1066_v35 = vmul.f32 %v3430_v39, %v772_v26 }
 0x1ba   : > { %v2223_v48 = vrot.slane %v2222_v37, 2  ;;  %v2229_v56 = vrot.slane %v2228_v27, 2  ;;  %v1442_v32 = vunpack.c.l.bf16 %v3704_v59  ;;  %v1443_v30 = vunpack.c.h.bf16 %v3704_v59 }
 0x1bb   : > { %v2070_v28 = vunpack.c.l.bf16 %v2004_v2  ;;  %v2071_v52 = vunpack.c.h.bf16 %v2004_v2  ;;  %v1712_v1 = vadd.f32 1.0, %v1632_v5  ;;  %v1713_v40 = vadd.f32 1.0, %v1633_v4 }
 0x1bc   : > { %v2823_v53 = vpop.eup %2822  ;;  %v2224_v55 = vadd.f32 %v2223_v48, %v2222_v37  ;;  %v2230_v38 = vadd.f32 %v2229_v56, %v2228_v27  ;;  %2826 = vtanh.f32 %v1442_v32  ;;  %v1214_v44 = vpack.c.bf16 %v1161_v49, %v1160_v34 }
 0x1bd   : > { %v2825_v29 = vpop.eup %2824  ;;  %v3713_v25 = vadd.f32 %v2133_v54, %v2070_v28  ;;  %v3715_v8 = vadd.f32 %v2140_v24, %v2071_v52  ;;  %v1790_v60 = vpack.c.bf16 %v1713_v40, %v1712_v1  ;;  %2828 = vtanh.f32 %v1443_v30  ;;  %v851_v52 = vpop.f32.mrf.mxu2 }
 0x1be   : > { %v2225_v11 = vrot.slane %v2224_v55, 1  ;;  %v2231_v58 = vrot.slane %v2230_v38, 1  ;;  %v1609_v0 = vpack.c.bf16 %v2825_v29, %v2823_v53  ;;  %v1029_v57 = vmul.f32 %v3618_v31, %v849_v46 }
 0x1bf   : > { %v1832_v24 = vunpack.c.l.bf16 %v1790_v60  ;;  %v1833_v63 = vunpack.c.h.bf16 %v1790_v60  ;;  %v1280_v41 = vunpack.c.l.bf16 %v1214_v44  ;;  %v1281_v9 = vunpack.c.h.bf16 %v1214_v44 }
 0x1c0   : > { %v2226_v62 = vadd.f32 %v2225_v11, %v2224_v55  ;;  %v2232_v14 = vadd.f32 %v2231_v58, %v2230_v38  ;;  %v1670_v15 = vunpack.c.l.bf16 %v1609_v0  ;;  %v1671_v54 = vunpack.c.h.bf16 %v1609_v0 }
 0x1c1   : > { %v1132_v34 = vadd.f32 %v3601_v17, %v1028_v16  ;;  %v1360_v21 = vmul.f32 0.5, %v1280_v41  ;;  %v1361_v23 = vmul.f32 0.5, %v1281_v9  ;;  %v1133_v42 = vadd.f32 %v3621_v50, %v1029_v57 }
 0x1c2   : > { %v2827_v7 = vpop.eup %2826  ;;  %v2282_v10 = vmul.f32 0.015625, %v2232_v14  ;;  %v1750_v18 = vadd.f32 1.0, %v1670_v15  ;;  %v1751_v36 = vadd.f32 1.0, %v1671_v54  ;;  %v1038_v37 = vmul.f32 %v3596_v13, %v822_v51 }
 0x1c3   : > { %v2829_v19 = vpop.eup %2828  ;;  %v2281_v27 = vmul.f32 0.015625, %v2226_v62  ;;  %v1912_v48 = vmul.f32 %v1832_v24, %v1432_v43  ;;  %v1913_v56 = vmul.f32 %v1833_v63, %v1433_v22  ;;  %v3728_v28 = vpack.c.bf16 %v1361_v23, %v1360_v21  ;;  %v774_v62 = vpop.f32.mrf.mxu3 }
 0x1c4   : > { %v2301_v2 = vrot.slane %v2282_v10, 7  ;;  %v1809_v5 = vpack.c.bf16 %v1751_v36, %v1750_v18  ;;  %v1595_v4 = vpack.c.bf16 %v2829_v19, %v2827_v7  ;;  %v1200_v16 = vpack.c.bf16 %v1133_v42, %v1132_v34  ;;  %v825_v7 = vpop.f32.mrf.mxu1  ;;  %v803_v34 = vpop.f32.mrf.mxu0 }
 0x1c5   : > { %v1480_v38 = vunpack.c.l.bf16 %v3728_v28  ;;  %v1481_v26 = vunpack.c.h.bf16 %v3728_v28  ;;  %v1990_v60 = vpack.c.bf16 %v1913_v56, %v1912_v48  ;;  %v1067_v57 = vmul.f32 %v3444_v47, %v801_v33 }
 0x1c6   : > { %v3731_v1 = vsel %vm2309_vm1, %v2281_v27, %v2301_v2  ;;  %v1870_v40 = vunpack.c.l.bf16 %v1809_v5  ;;  %v1871_v46 = vunpack.c.h.bf16 %v1809_v5  ;;  %v1642_v53 = vunpack.c.l.bf16 %v1595_v4  ;;  %v854_v27 = vpop.f32.mrf.mxu2 }
 0x1c7   : > { %v1643_v55 = vunpack.c.h.bf16 %v1595_v4  ;;  %v1252_v49 = vunpack.c.l.bf16 %v1200_v16  ;;  %v1253_v29 = vunpack.c.h.bf16 %v1200_v16  ;;  %2830 = vtanh.f32 %v1480_v38 }
 0x1c8   : > { %v1950_v6 = vmul.f32 %v1870_v40, %v1470_v61  ;;  %v1951_v43 = vmul.f32 %v1871_v46, %v1471_v20  ;;  %v1722_v22 = vadd.f32 1.0, %v1642_v53  ;;  %2832 = vtanh.f32 %v1481_v26 }
 0x1c9   : > { %v1723_v11 = vadd.f32 1.0, %v1643_v55  ;;  %v1332_v58 = vmul.f32 0.5, %v1252_v49  ;;  %v1333_v44 = vmul.f32 0.5, %v1253_v29  ;;  %v1170_v61 = vadd.f32 %v3440_v45, %v1066_v35 }
 0x1ca   : > { %v2009_v0 = vpack.c.bf16 %v1951_v43, %v1950_v6  ;;  %v1039_v20 = vmul.f32 %v3618_v31, %v851_v52  ;;  %v1171_v51 = vadd.f32 %v3464_v3, %v1067_v57  ;;  %v1142_v41 = vadd.f32 %v3601_v17, %v1038_v37 }
 0x1cb   : > { %v1795_v12 = vpack.c.bf16 %v1723_v11, %v1722_v22  ;;  %v3746_v54 = vpack.c.bf16 %v1333_v44, %v1332_v58  ;;  %v2042_v10 = vunpack.c.l.bf16 %v1990_v60  ;;  %v1076_v35 = vmul.f32 %v3430_v39, %v774_v62 }
 0x1cc   : > { %v2080_v14 = vunpack.c.l.bf16 %v2009_v0  ;;  %v2081_v15 = vunpack.c.h.bf16 %v2009_v0  ;;  %v1143_v9 = vadd.f32 %v3621_v50, %v1039_v20  ;;  %v1219_v42 = vpack.c.bf16 %v1171_v51, %v1170_v61  ;;  %v873_v61 = vpop.f32.mrf.mxu3 }
 0x1cd   : > { %v1842_v24 = vunpack.c.l.bf16 %v1795_v12  ;;  %v1843_v63 = vunpack.c.h.bf16 %v1795_v12  ;;  %v2831_v19 = vpop.eup %2830  ;;  %v2043_v5 = vunpack.c.h.bf16 %v1990_v60  ;;  %v1452_v39 = vunpack.c.l.bf16 %v3746_v54 }
 0x1ce   : > { %v3753_v18 = vadd.f32 %v3713_v25, %v2080_v14  ;;  %v3756_v36 = vadd.f32 %v3715_v8, %v2081_v15  ;;  %v1205_v37 = vpack.c.bf16 %v1143_v9, %v1142_v41  ;;  %v2833_v2 = vpop.eup %2832  ;;  %v1453_v25 = vunpack.c.h.bf16 %v3746_v54 }
 0x1cf   : > { %v1922_v21 = vmul.f32 %v1842_v24, %v1442_v32  ;;  %v1923_v23 = vmul.f32 %v1843_v63, %v1443_v30  ;;  %v1048_v8 = vmul.f32 %v3596_v13, %v825_v7  ;;  %v1614_v33 = vpack.c.bf16 %v2833_v2, %v2831_v19 }
 0x1d0   : > { %v1290_v48 = vunpack.c.l.bf16 %v1219_v42  ;;  %v1077_v56 = vmul.f32 %v3444_v47, %v803_v34  ;;  %v1291_v32 = vunpack.c.h.bf16 %v1219_v42  ;;  %v1262_v16 = vunpack.c.l.bf16 %v1205_v37 }
 0x1d1   : > { %v1995_v4 = vpack.c.bf16 %v1923_v23, %v1922_v21  ;;  %v1263_v59 = vunpack.c.h.bf16 %v1205_v37  ;;  %v1049_v30 = vmul.f32 %v3618_v31, %v854_v27  ;;  %v1680_v46 = vunpack.c.l.bf16 %v1614_v33 }
 0x1d2   : > { %v1681_v53 = vunpack.c.h.bf16 %v1614_v33  ;;  %v1370_v55 = vmul.f32 0.5, %v1290_v48  ;;  %v1371_v49 = vmul.f32 0.5, %v1291_v32  ;;  %v1342_v6 = vmul.f32 0.5, %v1262_v16 }
 0x1d3   : > { %v2052_v52 = vunpack.c.l.bf16 %v1995_v4  ;;  %v2053_v40 = vunpack.c.h.bf16 %v1995_v4  ;;  %v1343_v43 = vmul.f32 0.5, %v1263_v59  ;;  %v1760_v60 = vadd.f32 1.0, %v1680_v46  ;;  %v827_v46 = vpop.f32.mrf.mxu1 }
 0x1d4   : > { %v1761_v11 = vadd.f32 1.0, %v1681_v53  ;;  %2834 = vtanh.f32 %v1452_v39  ;;  %v3773_v47 = vpack.c.bf16 %v1371_v49, %v1370_v55  ;;  %v1181_v58 = vadd.f32 %v3464_v3, %v1077_v56  ;;  %v2930_v56 = vld [vmem:[#allocation10] sm:$0xff]  ;;  %v875_v16 = vpop.f32.mrf.mxu3  ;;  %v856_v53 = vpop.f32.mrf.mxu2 }
 0x1d5   : > { %v3767_v22 = vadd.f32 %v2052_v52, %v2042_v10  ;;  %v3769_v29 = vadd.f32 %v2053_v40, %v2043_v5  ;;  %v1153_v0 = vadd.f32 %v3621_v50, %v1049_v30  ;;  %v1180_v44 = vadd.f32 %v3440_v45, %v1076_v35  ;;  %v902_v52 = vpop.f32.mrf.mxu0 }
 0x1d6   : > { %v1814_v57 = vpack.c.bf16 %v1761_v11, %v1760_v60  ;;  %2836 = vtanh.f32 %v1453_v25  ;;  %v1490_v62 = vunpack.c.l.bf16 %v3773_v47  ;;  %v1491_v12 = vunpack.c.h.bf16 %v3773_v47  ;;  %v2931_v11 = vld [vmem:[#allocation11] sm:$0xff] }
 0x1d7   : > { %v1152_v20 = vadd.f32 %v3601_v17, %v1048_v8  ;;  %v3783_v51 = vpack.c.bf16 %v1343_v43, %v1342_v6  ;;  %v1224_v3 = vpack.c.bf16 %v1181_v58, %v1180_v44  ;;  %v3805_v32 = vperm.slane %v2930_v56, 7 }
 0x1d8   : > { %v1880_v14 = vunpack.c.l.bf16 %v1814_v57  ;;  %v1881_v15 = vunpack.c.h.bf16 %v1814_v57  ;;  %2838 = vtanh.f32 %v1490_v62  ;;  %v3810_v40 = vperm.slane %v2930_v56, 6 }
 0x1d9   : > { %v1210_v45 = vpack.c.bf16 %v1153_v0, %v1152_v20  ;;  %2840 = vtanh.f32 %v1491_v12  ;;  %v1300_v41 = vunpack.c.l.bf16 %v1224_v3  ;;  %v1301_v7 = vunpack.c.h.bf16 %v1224_v3 }
 0x1da   : > { %v1960_v24 = vmul.f32 %v1880_v14, %v1480_v38  ;;  %v1961_v63 = vmul.f32 %v1881_v15, %v1481_v26  ;;  %v2835_v9 = vpop.eup %2834  ;;  %v1462_v34 = vunpack.c.l.bf16 %v3783_v51  ;;  %v1463_v23 = vunpack.c.h.bf16 %v3783_v51 }
 0x1db   : > { %v1380_v19 = vmul.f32 0.5, %v1300_v41  ;;  %v1272_v21 = vunpack.c.l.bf16 %v1210_v45  ;;  %v1381_v42 = vmul.f32 0.5, %v1301_v7  ;;  %v1273_v37 = vunpack.c.h.bf16 %v1210_v45 }
 0x1dc   : > { %v2837_v10 = vpop.eup %2836  ;;  %v2014_v35 = vpack.c.bf16 %v1961_v63, %v1960_v24  ;;  %2842 = vtanh.f32 %v1462_v34  ;;  %v1011_v60 = vmul.f32 %v3805_v32, %v902_v52  ;;  %v3818_v58 = vperm.slane %v2931_v11, 7 }
 0x1dd   : > { %v1352_v28 = vmul.f32 0.5, %v1272_v21  ;;  %v1600_v2 = vpack.c.bf16 %v2837_v10, %v2835_v9  ;;  %v3795_v5 = vpack.c.bf16 %v1381_v42, %v1380_v19  ;;  %v1353_v8 = vmul.f32 0.5, %v1273_v37 }
 0x1de   : > { %v2090_v38 = vunpack.c.l.bf16 %v2014_v35  ;;  %v2091_v27 = vunpack.c.h.bf16 %v2014_v35  ;;  %v2839_v26 = vpop.eup %2838  ;;  %2844 = vtanh.f32 %v1463_v23  ;;  %v1058_v57 = vmul.f32 %v3596_v13, %v827_v46 }
 0x1df   : > { %v2841_v4 = vpop.eup %2840  ;;  %v1500_v30 = vunpack.c.l.bf16 %v3795_v5  ;;  %v1652_v55 = vunpack.c.l.bf16 %v1600_v2  ;;  %v1653_v43 = vunpack.c.h.bf16 %v1600_v2  ;;  %v1059_v20 = vmul.f32 %v3618_v31, %v856_v53 }
 0x1e0   : > { %v3798_v33 = vadd.f32 %v3753_v18, %v2090_v38  ;;  %v3801_v48 = vadd.f32 %v3756_v36, %v2091_v27  ;;  %v1619_v59 = vpack.c.bf16 %v2841_v4, %v2839_v26  ;;  %v1501_v18 = vunpack.c.h.bf16 %v3795_v5  ;;  %v878_v26 = vpop.f32.mrf.mxu3 }
 0x1e1   : > { %v3813_v36 = vpack.c.bf16 %v1353_v8, %v1352_v28  ;;  %2846 = vtanh.f32 %v1500_v30  ;;  %v1010_v15 = vmul.f32 %v3810_v40, %v873_v61  ;;  %v3823_v3 = vperm.slane %v2931_v11, 6 }
 0x1e2   : > { %v1690_v49 = vunpack.c.l.bf16 %v1619_v59  ;;  %v1691_v6 = vunpack.c.h.bf16 %v1619_v59  ;;  %v2843_v14 = vpop.eup %2842  ;;  %2848 = vtanh.f32 %v1501_v18  ;;  %v1732_v9 = vadd.f32 1.0, %v1652_v55 }
 0x1e3   : > { %v1472_v45 = vunpack.c.l.bf16 %v3813_v36  ;;  %v1473_v41 = vunpack.c.h.bf16 %v3813_v36  ;;  %v1733_v7 = vadd.f32 1.0, %v1653_v43  ;;  %v1115_v10 = vadd.f32 %v3818_v58, %v1011_v60  ;;  %v904_v60 = vpop.f32.mrf.mxu0 }
 0x1e4   : > { %v1770_v0 = vadd.f32 1.0, %v1690_v49  ;;  %v1771_v44 = vadd.f32 1.0, %v1691_v6  ;;  %v2845_v24 = vpop.eup %2844  ;;  %v1162_v21 = vadd.f32 %v3601_v17, %v1058_v57  ;;  %v1163_v61 = vadd.f32 %v3621_v50, %v1059_v20 }
 0x1e5   : > { %v1114_v37 = vadd.f32 %v3823_v3, %v1010_v15  ;;  %v1605_v38 = vpack.c.bf16 %v2845_v24, %v2843_v14  ;;  %2850 = vtanh.f32 %v1472_v45  ;;  %v1800_v4 = vpack.c.bf16 %v1733_v7, %v1732_v9 }
 0x1e6   : > { %v1819_v63 = vpack.c.bf16 %v1771_v44, %v1770_v0  ;;  %2852 = vtanh.f32 %v1473_v41  ;;  %v1215_v2 = vpack.c.bf16 %v1163_v61, %v1162_v21  ;;  %v1020_v11 = vmul.f32 %v3810_v40, %v875_v16 }
 0x1e7   : > { %v2847_v42 = vpop.eup %2846  ;;  %v1191_v56 = vpack.c.bf16 %v1115_v10, %v1114_v37  ;;  %v1662_v46 = vunpack.c.l.bf16 %v1605_v38  ;;  %v1663_v53 = vunpack.c.h.bf16 %v1605_v38  ;;  %v1021_v10 = vmul.f32 %v3805_v32, %v904_v60  ;;  %v859_v38 = vpop.f32.mrf.mxu2 }
 0x1e8   : > { %v1890_v35 = vunpack.c.l.bf16 %v1819_v63  ;;  %v1891_v19 = vunpack.c.h.bf16 %v1819_v63  ;;  %v2849_v8 = vpop.eup %2848  ;;  %v1282_v55 = vunpack.c.l.bf16 %v1215_v2  ;;  %v1853_v63 = vunpack.c.h.bf16 %v1800_v4 }
 0x1e9   : > { %v1624_v52 = vpack.c.bf16 %v2849_v8, %v2847_v42  ;;  %v1234_v0 = vunpack.c.l.bf16 %v1191_v56  ;;  %v1235_v44 = vunpack.c.h.bf16 %v1191_v56  ;;  %v1742_v9 = vadd.f32 1.0, %v1662_v46 }
 0x1ea   : > { %v1970_v27 = vmul.f32 %v1890_v35, %v1490_v62  ;;  %v1971_v28 = vmul.f32 %v1891_v19, %v1491_v12  ;;  %v1852_v12 = vunpack.c.l.bf16 %v1800_v4  ;;  %v1743_v7 = vadd.f32 1.0, %v1663_v53  ;;  %v830_v4 = vpop.f32.mrf.mxu1 }
 0x1eb   : > { %v1700_v43 = vunpack.c.l.bf16 %v1624_v52  ;;  %v1701_v62 = vunpack.c.h.bf16 %v1624_v52  ;;  %v2851_v47 = vpop.eup %2850  ;;  %v1283_v19 = vunpack.c.h.bf16 %v1215_v2  ;;  %v1362_v21 = vmul.f32 0.5, %v1282_v55 }
 0x1ec   : > { %v2019_v59 = vpack.c.bf16 %v1971_v28, %v1970_v27  ;;  %v2853_v57 = vpop.eup %2852  ;;  %v1124_v61 = vadd.f32 %v3823_v3, %v1020_v11  ;;  %v1314_v42 = vmul.f32 0.5, %v1234_v0  ;;  %v1315_v37 = vmul.f32 0.5, %v1235_v44  ;;  %v880_v28 = vpop.f32.mrf.mxu3 }
 0x1ed   : > { %v1780_v15 = vadd.f32 1.0, %v1700_v43  ;;  %v1781_v24 = vadd.f32 1.0, %v1701_v62  ;;  %v1610_v16 = vpack.c.bf16 %v2853_v57, %v2851_v47  ;;  %v1363_v8 = vmul.f32 0.5, %v1283_v19 }
 0x1ee   : > { %v2100_v49 = vunpack.c.l.bf16 %v2019_v59  ;;  %v2101_v6 = vunpack.c.h.bf16 %v2019_v59  ;;  %v1932_v56 = vmul.f32 %v1852_v12, %v1452_v39  ;;  %v1933_v2 = vmul.f32 %v1853_v63, %v1453_v25 }
 0x1ef   : > { %v1824_v35 = vpack.c.bf16 %v1781_v24, %v1780_v15  ;;  %v1805_v59 = vpack.c.bf16 %v1743_v7, %v1742_v9  ;;  %v1125_v52 = vadd.f32 %v3818_v58, %v1021_v10  ;;  %v3856_v53 = vpack.c.bf16 %v1363_v8, %v1362_v21 }
 0x1f0   : > { %v2137_v20 = vadd.f32 %v3798_v33, %v2100_v49  ;;  %v2144_v14 = vadd.f32 %v3801_v48, %v2101_v6  ;;  %v1030_v33 = vmul.f32 %v3810_v40, %v878_v26  ;;  %v1069_v55 = vmul.f32 %v3618_v31, %v859_v38 }
 0x1f1   : > { %v1900_v27 = vunpack.c.l.bf16 %v1824_v35  ;;  %v1901_v48 = vunpack.c.h.bf16 %v1824_v35  ;;  %v1672_v49 = vunpack.c.l.bf16 %v1610_v16  ;;  %v1673_v6 = vunpack.c.h.bf16 %v1610_v16 }
 0x1f2   : > { %v1040_v39 = vmul.f32 %v3810_v40, %v880_v28  ;;  %v3860_v43 = vpack.c.bf16 %v1315_v37, %v1314_v42  ;;  %v1482_v25 = vunpack.c.l.bf16 %v3856_v53  ;;  %v1483_v62 = vunpack.c.h.bf16 %v3856_v53  ;;  %v832_v38 = vpop.f32.mrf.mxu1 }
 0x1f3   : > { %v1980_v46 = vmul.f32 %v1900_v27, %v1500_v30  ;;  %v1981_v26 = vmul.f32 %v1901_v48, %v1501_v18  ;;  %v1068_v30 = vmul.f32 %v3596_v13, %v830_v4  ;;  %v3865_v60 = vpack.c.bf16 %v1933_v2, %v1932_v56 }
 0x1f4   : > { %v1862_v5 = vunpack.c.l.bf16 %v1805_v59  ;;  %v1863_v18 = vunpack.c.h.bf16 %v1805_v59  ;;  %v1196_v47 = vpack.c.bf16 %v1125_v52, %v1124_v61  ;;  %2854 = vtanh.f32 %v1482_v25 }
 0x1f5   : > { %v2024_v54 = vpack.c.bf16 %v1981_v26, %v1980_v46  ;;  %v1173_v0 = vadd.f32 %v3621_v50, %v1069_v55  ;;  %v1752_v44 = vadd.f32 1.0, %v1672_v49  ;;  %v1753_v57 = vadd.f32 1.0, %v1673_v6  ;;  %v907_v49 = vpop.f32.mrf.mxu0 }
 0x1f6   : > { %v1434_v15 = vunpack.c.l.bf16 %v3860_v43  ;;  %2856 = vtanh.f32 %v1483_v62  ;;  %v1435_v9 = vunpack.c.h.bf16 %v3860_v43  ;;  %v1172_v7 = vadd.f32 %v3601_v17, %v1068_v30 }
 0x1f7   : > { %v2110_v12 = vunpack.c.l.bf16 %v2024_v54  ;;  %v2111_v11 = vunpack.c.h.bf16 %v2024_v54  ;;  %v2062_v10 = vunpack.c.l.bf16 %v3865_v60  ;;  %v1134_v35 = vadd.f32 %v3823_v3, %v1030_v33 }
 0x1f8   : > { %v3878_v19 = vadd.f32 %v3823_v3, %v1040_v39  ;;  %v1244_v21 = vunpack.c.l.bf16 %v1196_v47  ;;  %v1245_v42 = vunpack.c.h.bf16 %v1196_v47  ;;  %v1220_v37 = vpack.c.bf16 %v1173_v0, %v1172_v7  ;;  %v861_v39 = vpop.f32.mrf.mxu2  ;;  %v883_v47 = vpop.f32.mrf.mxu3 }
 0x1f9   : > { %v2138_v24 = vadd.f32 %v2137_v20, %v2110_v12  ;;  %v2145_v63 = vadd.f32 %v2144_v14, %v2111_v11  ;;  %v2063_v20 = vunpack.c.h.bf16 %v3865_v60  ;;  %v1942_v14 = vmul.f32 %v1862_v5, %v1462_v34 }
 0x1fa   : > { %v1810_v27 = vpack.c.bf16 %v1753_v57, %v1752_v44  ;;  %2858 = vtanh.f32 %v1434_v15  ;;  %v2855_v48 = vpop.eup %2854  ;;  %v1943_v33 = vmul.f32 %v1863_v18, %v1463_v23  ;;  %v3890_v56 = vadd.f32 %v3767_v22, %v2062_v10 }
 0x1fb   : > { %v2233_v61 = vrot.slane %v2138_v24, 4  ;;  %v2239_v16 = vrot.slane %v2145_v63, 4  ;;  %2860 = vtanh.f32 %v1435_v9  ;;  %v1292_v2 = vunpack.c.l.bf16 %v1220_v37 }
 0x1fc   : > { %v2857_v4 = vpop.eup %2856  ;;  %v1293_v59 = vunpack.c.h.bf16 %v1220_v37  ;;  %v1078_v34 = vmul.f32 %v3596_v13, %v832_v38  ;;  %v1324_v26 = vmul.f32 0.5, %v1244_v21  ;;  %v1325_v55 = vmul.f32 0.5, %v1245_v42 }
 0x1fd   : > { %v2234_v28 = vadd.f32 %v2233_v61, %v2138_v24  ;;  %v2240_v8 = vadd.f32 %v2239_v16, %v2145_v63  ;;  %v1872_v51 = vunpack.c.l.bf16 %v1810_v27  ;;  %v1873_v23 = vunpack.c.h.bf16 %v1810_v27 }
 0x1fe   : > { %v1372_v6 = vmul.f32 0.5, %v1292_v2  ;;  %v3893_v54 = vpack.c.bf16 %v1943_v33, %v1942_v14  ;;  %v1615_v22 = vpack.c.bf16 %v2857_v4, %v2855_v48  ;;  %v1373_v12 = vmul.f32 0.5, %v1293_v59 }
 0x1ff   : > { %v2235_v52 = vrot.slane %v2234_v28, 2  ;;  %v2241_v46 = vrot.slane %v2240_v8, 2  ;;  %v1182_v13 = vadd.f32 %v3601_v17, %v1078_v34  ;;  %v1031_v11 = vmul.f32 %v3805_v32, %v907_v49 }
 0x200   : > { %v2859_v18 = vpop.eup %2858  ;;  %v3897_v24 = vpack.c.bf16 %v1325_v55, %v1324_v26  ;;  %v1079_v63 = vmul.f32 %v3618_v31, %v861_v39  ;;  %v1952_v7 = vmul.f32 %v1872_v51, %v1472_v45  ;;  %v1953_v10 = vmul.f32 %v1873_v23, %v1473_v41 }
 0x201   : > { %v2236_v30 = vadd.f32 %v2235_v52, %v2234_v28  ;;  %v2242_v5 = vadd.f32 %v2241_v46, %v2240_v8  ;;  %v2861_v0 = vpop.eup %2860  ;;  %v3904_v21 = vpack.c.bf16 %v1373_v12, %v1372_v6  ;;  %v1135_v61 = vadd.f32 %v3818_v58, %v1031_v11 }
 0x202   : > { %v1682_v42 = vunpack.c.l.bf16 %v1615_v22  ;;  %v1683_v37 = vunpack.c.h.bf16 %v1615_v22  ;;  %v1591_v38 = vpack.c.bf16 %v2861_v0, %v2859_v18  ;;  %v1444_v45 = vunpack.c.l.bf16 %v3897_v24 }
 0x203   : > { %v2237_v44 = vrot.slane %v2236_v30, 1  ;;  %v2243_v57 = vrot.slane %v2242_v5, 1  ;;  %v1492_v14 = vunpack.c.l.bf16 %v3904_v21  ;;  %v1493_v27 = vunpack.c.h.bf16 %v3904_v21 }
 0x204   : > { %v1201_v31 = vpack.c.bf16 %v1135_v61, %v1134_v35  ;;  %v1183_v36 = vadd.f32 %v3621_v50, %v1079_v63  ;;  %v1445_v41 = vunpack.c.h.bf16 %v3897_v24  ;;  %v1762_v59 = vadd.f32 1.0, %v1682_v42  ;;  %v1085_v63 = vld [vmem:[#allocation11 + $0x8] sm:$0x3] }
 0x205   : > { %v2238_v17 = vadd.f32 %v2237_v44, %v2236_v30  ;;  %v2244_v16 = vadd.f32 %v2243_v57, %v2242_v5  ;;  %2862 = vtanh.f32 %v1492_v14  ;;  %v1763_v34 = vadd.f32 1.0, %v1683_v37 }
 0x206   : > { %v1254_v28 = vunpack.c.l.bf16 %v1201_v31  ;;  %v1255_v8 = vunpack.c.h.bf16 %v1201_v31  ;;  %v3917_v35 = vadd.f32 %v3769_v29, %v2063_v20  ;;  %v2072_v52 = vunpack.c.l.bf16 %v3893_v54  ;;  %v885_v29 = vpop.f32.mrf.mxu3  ;;  %v981_v20 = vld [vmem:[#allocation10 + $0x8] sm:$0x3] }
 0x207   : > { %v2283_v48 = vmul.f32 0.015625, %v2238_v17  ;;  %v2284_v33 = vmul.f32 0.015625, %v2244_v16  ;;  %2864 = vtanh.f32 %v1493_v27  ;;  %v3923_v26 = vpack.c.bf16 %v1953_v10, %v1952_v7 }
 0x208   : > { %v1334_v50 = vmul.f32 0.5, %v1254_v28  ;;  %v1335_v55 = vmul.f32 0.5, %v1255_v8  ;;  %v1225_v49 = vpack.c.bf16 %v1183_v36, %v1182_v13  ;;  %v1634_v60 = vunpack.c.l.bf16 %v1591_v38  ;;  %v909_v13 = vpop.f32.mrf.mxu0 }
 0x209   : > { %v2302_v4 = vrot.slane %v2283_v48, 6  ;;  %v2303_v2 = vrot.slane %v2284_v33, 5  ;;  %v1635_v23 = vunpack.c.h.bf16 %v1591_v38  ;;  %2866 = vtanh.f32 %v1444_v45 }
 0x20a   : > { %v1815_v6 = vpack.c.bf16 %v1763_v34, %v1762_v59  ;;  %2868 = vtanh.f32 %v1445_v41  ;;  %v3933_v39 = vpack.c.bf16 %v1335_v55, %v1334_v50  ;;  %v1302_v30 = vunpack.c.l.bf16 %v1225_v49  ;;  %v960_v59 = vpop.f32.mrf.mxu2 }
 0x20b   : > { %v2312_v46 = vsel %vm2311_vm2, %v2302_v4, %v2303_v2  ;;  %v2863_v5 = vpop.eup %2862  ;;  %v2073_v22 = vunpack.c.h.bf16 %v3893_v54  ;;  %v3940_v18 = vmul.f32 %v3810_v40, %v883_v47  ;;  %v1303_v12 = vunpack.c.h.bf16 %v1225_v49  ;;  %v931_v47 = vpop.f32.mrf.mxu1 }
 0x20c   : > { %v3927_v51 = vsel %vm2313_vm3, %v3731_v1, %v2312_v46  ;;  %v3937_v1 = vadd.f32 %v3890_v56, %v2072_v52  ;;  %v2082_v11 = vunpack.c.l.bf16 %v3923_v26  ;;  %v3944_v0 = vmul.f32 %v3810_v40, %v885_v29 }
 0x20d   : > { %v1454_v44 = vunpack.c.l.bf16 %v3933_v39  ;;  %v3947_v57 = vperm.slane %v981_v20, 0  ;;  %v2865_v7 = vpop.eup %2864  ;;  %v1714_v54 = vadd.f32 1.0, %v1634_v60  ;;  %v1455_v56 = vunpack.c.h.bf16 %v3933_v39 }
 0x20e   : > { %v1382_v10 = vmul.f32 0.5, %v1302_v30  ;;  %v1383_v61 = vmul.f32 0.5, %v1303_v12  ;;  %v1715_v17 = vadd.f32 1.0, %v1635_v23  ;;  %v1882_v16 = vunpack.c.l.bf16 %v1815_v6 }
 0x20f   : > { %v1620_v42 = vpack.c.bf16 %v2865_v7, %v2863_v5  ;;  %v1041_v37 = vmul.f32 %v3805_v32, %v909_v13  ;;  %v2867_v38 = vpop.eup %2866  ;;  %v1883_v31 = vunpack.c.h.bf16 %v1815_v6  ;;  %2870 = vtanh.f32 %v1454_v44 }
 0x210   : > { %v3953_v48 = vpack.c.bf16 %v1383_v61, %v1382_v10  ;;  %v3955_v33 = vperm.slane %v1085_v63, 0  ;;  %v2869_v36 = vpop.eup %2868  ;;  %v1012_v4 = vmul.f32 %v3947_v57, %v931_v47  ;;  %2872 = vtanh.f32 %v1455_v56 }
 0x211   : > { %v1692_v28 = vunpack.c.l.bf16 %v1620_v42  ;;  %v1693_v8 = vunpack.c.h.bf16 %v1620_v42  ;;  %v1145_v2 = vadd.f32 %v3818_v58, %v1041_v37  ;;  %v3963_v50 = vperm.slane %v981_v20, 1 }
 0x212   : > { %v1502_v34 = vunpack.c.l.bf16 %v3953_v48  ;;  %v1503_v52 = vunpack.c.h.bf16 %v3953_v48  ;;  %v3966_v60 = vperm.slane %v1085_v63, 1  ;;  %v1791_v23 = vpack.c.bf16 %v1715_v17, %v1714_v54 }
 0x213   : > { %v1772_v46 = vadd.f32 1.0, %v1692_v28  ;;  %v1773_v55 = vadd.f32 1.0, %v1693_v8  ;;  %v1206_v49 = vpack.c.bf16 %v1145_v2, %v3878_v19  ;;  %v1596_v29 = vpack.c.bf16 %v2869_v36, %v2867_v38 }
 0x214   : > { %2874 = vtanh.f32 %v1502_v34  ;;  %v1013_v6 = vmul.f32 %v3963_v50, %v960_v59  ;;  %v2083_v13 = vunpack.c.h.bf16 %v3923_v26  ;;  %v1962_v19 = vmul.f32 %v1882_v16, %v1482_v25  ;;  %v912_v26 = vpop.f32.mrf.mxu0 }
 0x215   : > { %v1820_v30 = vpack.c.bf16 %v1773_v55, %v1772_v46  ;;  %2876 = vtanh.f32 %v1503_v52  ;;  %v1264_v5 = vunpack.c.l.bf16 %v1206_v49  ;;  %v1265_v20 = vunpack.c.h.bf16 %v1206_v49  ;;  %v2871_v12 = vpop.eup %2870  ;;  %v933_v55 = vpop.f32.mrf.mxu1 }
 0x216   : > { %v1116_v63 = vadd.f32 %v3955_v33, %v1012_v4  ;;  %v1117_v7 = vadd.f32 %v3966_v60, %v1013_v6  ;;  %v1963_v54 = vmul.f32 %v1883_v31, %v1483_v62  ;;  %v2873_v17 = vpop.eup %2872  ;;  %v2155_v42 = vadd.f32 %v3917_v35, %v2073_v22 }
 0x217   : > { %v1892_v10 = vunpack.c.l.bf16 %v1820_v30  ;;  %v1893_v61 = vunpack.c.h.bf16 %v1820_v30  ;;  %v1344_v47 = vmul.f32 0.5, %v1264_v5  ;;  %v1834_v37 = vunpack.c.l.bf16 %v1791_v23  ;;  %v962_v5 = vpop.f32.mrf.mxu2 }
 0x218   : > { %v1345_v38 = vmul.f32 0.5, %v1265_v20  ;;  %v1192_v36 = vpack.c.bf16 %v1117_v7, %v1116_v63  ;;  %v1835_v28 = vunpack.c.h.bf16 %v1791_v23  ;;  %v1644_v8 = vunpack.c.l.bf16 %v1596_v29 }
 0x219   : > { %v1645_v25 = vunpack.c.h.bf16 %v1596_v29  ;;  %v2149_v4 = vadd.f32 %v3937_v1, %v2082_v11  ;;  %v2156_v2 = vadd.f32 %v2155_v42, %v2083_v13  ;;  %v1154_v53 = vadd.f32 %v3823_v3, %v3940_v18 }
 0x21a   : > { %v2875_v16 = vpop.eup %2874  ;;  %v3986_v62 = vadd.f32 %v3823_v3, %v3944_v0  ;;  %v2015_v35 = vpack.c.bf16 %v1963_v54, %v1962_v19  ;;  %v1972_v22 = vmul.f32 %v1892_v10, %v1492_v14  ;;  %v1973_v59 = vmul.f32 %v1893_v61, %v1493_v27 }
 0x21b   : > { %v2877_v31 = vpop.eup %2876  ;;  %v3992_v46 = vpack.c.bf16 %v1345_v38, %v1344_v47  ;;  %v3996_v1 = vmul.f32 %v1834_v37, %v1434_v15  ;;  %v1236_v11 = vunpack.c.l.bf16 %v1192_v36  ;;  %v1237_v49 = vunpack.c.h.bf16 %v1192_v36 }
 0x21c   : > { %v1625_v18 = vpack.c.bf16 %v2877_v31, %v2875_v16  ;;  %v1915_v0 = vmul.f32 %v1835_v28, %v1435_v9  ;;  %v1724_v23 = vadd.f32 1.0, %v1644_v8  ;;  %v1725_v29 = vadd.f32 1.0, %v1645_v25  ;;  %v914_v38 = vpop.f32.mrf.mxu0 }
 0x21d   : > { %v1051_v14 = vmul.f32 %v3805_v32, %v912_v26  ;;  %v1601_v6 = vpack.c.bf16 %v2873_v17, %v2871_v12  ;;  %v1022_v30 = vmul.f32 %v3947_v57, %v933_v55  ;;  %v2092_v20 = vunpack.c.l.bf16 %v2015_v35 }
 0x21e   : > { %v1702_v21 = vunpack.c.l.bf16 %v1625_v18  ;;  %v1703_v27 = vunpack.c.h.bf16 %v1625_v18  ;;  %v2020_v13 = vpack.c.bf16 %v1973_v59, %v1972_v22  ;;  %v1464_v15 = vunpack.c.l.bf16 %v3992_v46 }
 0x21f   : > { %v1465_v19 = vunpack.c.h.bf16 %v3992_v46  ;;  %v1316_v43 = vmul.f32 0.5, %v1236_v11  ;;  %v1317_v9 = vmul.f32 0.5, %v1237_v49  ;;  %v2093_v54 = vunpack.c.h.bf16 %v2015_v35 }
 0x220   : > { %v1782_v63 = vadd.f32 1.0, %v1702_v21  ;;  %v1783_v7 = vadd.f32 1.0, %v1703_v27  ;;  %v4004_v10 = vpack.c.bf16 %v1725_v29, %v1724_v23  ;;  %v1155_v12 = vadd.f32 %v3818_v58, %v1051_v14 }
 0x221   : > { %v1023_v61 = vmul.f32 %v3963_v50, %v962_v5  ;;  %v1654_v47 = vunpack.c.l.bf16 %v1601_v6  ;;  %v1655_v17 = vunpack.c.h.bf16 %v1601_v6  ;;  %v1126_v37 = vadd.f32 %v3955_v33, %v1022_v30 }
 0x222   : > { %v1825_v42 = vpack.c.bf16 %v1783_v7, %v1782_v63  ;;  %v2102_v36 = vunpack.c.l.bf16 %v2020_v13  ;;  %2878 = vtanh.f32 %v1464_v15  ;;  %v1211_v26 = vpack.c.bf16 %v1155_v12, %v1154_v53 }
 0x223   : > { %v1127_v28 = vadd.f32 %v3966_v60, %v1023_v61  ;;  %2880 = vtanh.f32 %v1465_v19  ;;  %v4014_v16 = vpack.c.bf16 %v1317_v9, %v1316_v43  ;;  %v2150_v31 = vadd.f32 %v2149_v4, %v2092_v20 }
 0x224   : > { %v1902_v8 = vunpack.c.l.bf16 %v1825_v42  ;;  %v1903_v25 = vunpack.c.h.bf16 %v1825_v42  ;;  %v2103_v35 = vunpack.c.h.bf16 %v2020_v13  ;;  %v1274_v22 = vunpack.c.l.bf16 %v1211_v26 }
 0x225   : > { %v1061_v59 = vmul.f32 %v3805_v32, %v914_v38  ;;  %v1275_v18 = vunpack.c.h.bf16 %v1211_v26  ;;  %v1197_v11 = vpack.c.bf16 %v1127_v28, %v1126_v37  ;;  %v2157_v49 = vadd.f32 %v2156_v2, %v2093_v54 }
 0x226   : > { %v1982_v55 = vmul.f32 %v1902_v8, %v1502_v34  ;;  %v1983_v53 = vmul.f32 %v1903_v25, %v1503_v52  ;;  %v1734_v23 = vadd.f32 1.0, %v1654_v47  ;;  %v1735_v29 = vadd.f32 1.0, %v1655_v17  ;;  %v888_v17 = vpop.f32.mrf.mxu3 }
 0x227   : > { %v1354_v14 = vmul.f32 0.5, %v1274_v22  ;;  %v2151_v6 = vadd.f32 %v2150_v31, %v2102_v36  ;;  %v1436_v4 = vunpack.c.l.bf16 %v4014_v16  ;;  %v1355_v27 = vmul.f32 0.5, %v1275_v18  ;;  %v965_v22 = vpop.f32.mrf.mxu2 }
 0x228   : > { %v2025_v21 = vpack.c.bf16 %v1983_v53, %v1982_v55  ;;  %v2879_v30 = vpop.eup %2878  ;;  %v1437_v5 = vunpack.c.h.bf16 %v4014_v16  ;;  %v1246_v20 = vunpack.c.l.bf16 %v1197_v11  ;;  %v1247_v13 = vunpack.c.h.bf16 %v1197_v11  ;;  %v936_v11 = vpop.f32.mrf.mxu1 }
 0x229   : > { %v1165_v34 = vadd.f32 %v3818_v58, %v1061_v59  ;;  %v2881_v48 = vpop.eup %2880  ;;  %v2158_v52 = vadd.f32 %v2157_v49, %v2103_v35  ;;  %v4024_v2 = vpack.c.bf16 %v1355_v27, %v1354_v14  ;;  %v4027_v43 = vpack.c.bf16 %v1915_v0, %v3996_v1 }
 0x22a   : > { %v2112_v63 = vunpack.c.l.bf16 %v2025_v21  ;;  %v2113_v7 = vunpack.c.h.bf16 %v2025_v21  ;;  %v1844_v9 = vunpack.c.l.bf16 %v4004_v10  ;;  %v1845_v12 = vunpack.c.h.bf16 %v4004_v10 }
 0x22b   : > { %v1216_v54 = vpack.c.bf16 %v1165_v34, %v3986_v62  ;;  %2882 = vtanh.f32 %v1436_v4  ;;  %v1606_v42 = vpack.c.bf16 %v2881_v48, %v2879_v30  ;;  %v1326_v37 = vmul.f32 0.5, %v1246_v20 }
 0x22c   : > { %v2152_v61 = vadd.f32 %v2151_v6, %v2112_v63  ;;  %v2159_v47 = vadd.f32 %v2158_v52, %v2113_v7  ;;  %2884 = vtanh.f32 %v1437_v5  ;;  %v1327_v38 = vmul.f32 0.5, %v1247_v13 }
 0x22d   : > { %v1801_v1 = vpack.c.bf16 %v1735_v29, %v1734_v23  ;;  %v1474_v26 = vunpack.c.l.bf16 %v4024_v2  ;;  %v2044_v62 = vunpack.c.l.bf16 %v4027_v43  ;;  %v1475_v10 = vunpack.c.h.bf16 %v4024_v2 }
 0x22e   : > { %v2245_v0 = vrot.slane %v2152_v61, 4  ;;  %v2251_v36 = vrot.slane %v2159_v47, 4  ;;  %v1284_v28 = vunpack.c.l.bf16 %v1216_v54  ;;  %v1924_v8 = vmul.f32 %v1844_v9, %v1444_v45 }
 0x22f   : > { %v4042_v35 = vmul.f32 %v3810_v40, %v888_v17  ;;  %v1925_v59 = vmul.f32 %v1845_v12, %v1445_v41  ;;  %v1664_v55 = vunpack.c.l.bf16 %v1606_v42  ;;  %v1665_v53 = vunpack.c.h.bf16 %v1606_v42 }
 0x230   : > { %v2246_v25 = vadd.f32 %v2245_v0, %v2152_v61  ;;  %v2252_v31 = vadd.f32 %v2251_v36, %v2159_v47  ;;  %v4046_v18 = vpack.c.bf16 %v1327_v38, %v1326_v37  ;;  %v1854_v23 = vunpack.c.l.bf16 %v1801_v1 }
 0x231   : > { %v2883_v49 = vpop.eup %2882  ;;  %2886 = vtanh.f32 %v1474_v26  ;;  %v1285_v6 = vunpack.c.h.bf16 %v1216_v54  ;;  %v1364_v21 = vmul.f32 0.5, %v1284_v28  ;;  %v1033_v24 = vmul.f32 %v3963_v50, %v965_v22 }
 0x232   : > { %v2247_v29 = vrot.slane %v2246_v25, 2  ;;  %v2253_v14 = vrot.slane %v2252_v31, 2  ;;  %v2885_v45 = vpop.eup %2884  ;;  %2888 = vtanh.f32 %v1475_v10  ;;  %v1855_v41 = vunpack.c.h.bf16 %v1801_v1 }
 0x233   : > { %v1032_v20 = vmul.f32 %v3947_v57, %v936_v11  ;;  %v1744_v13 = vadd.f32 1.0, %v1664_v55  ;;  %v1745_v34 = vadd.f32 1.0, %v1665_v53  ;;  %v1446_v48 = vunpack.c.l.bf16 %v4046_v18  ;;  %v917_v55 = vpop.f32.mrf.mxu0 }
 0x234   : > { %v2248_v27 = vadd.f32 %v2247_v29, %v2246_v25  ;;  %v2254_v30 = vadd.f32 %v2253_v14, %v2252_v31  ;;  %v1365_v52 = vmul.f32 0.5, %v1285_v6  ;;  %v1592_v9 = vpack.c.bf16 %v2885_v45, %v2883_v49 }
 0x235   : > { %v1447_v12 = vunpack.c.h.bf16 %v4046_v18  ;;  %v4056_v61 = vpack.c.bf16 %v1925_v59, %v1924_v8  ;;  %v1934_v54 = vmul.f32 %v1854_v23, %v1454_v44  ;;  %v1137_v17 = vadd.f32 %v3966_v60, %v1033_v24  ;;  %v938_v59 = vpop.f32.mrf.mxu1  ;;  %v967_v23 = vpop.f32.mrf.mxu2 }
 0x236   : > { %v2249_v63 = vrot.slane %v2248_v27, 1  ;;  %v2255_v7 = vrot.slane %v2254_v30, 1  ;;  %v4060_v47 = vpack.c.bf16 %v1365_v52, %v1364_v21  ;;  %v1935_v37 = vmul.f32 %v1855_v41, %v1455_v56 }
 0x237   : > { %v2887_v42 = vpop.eup %2886  ;;  %v1136_v0 = vadd.f32 %v3955_v33, %v1032_v20  ;;  %v1806_v28 = vpack.c.bf16 %v1745_v34, %v1744_v13  ;;  %2890 = vtanh.f32 %v1446_v48  ;;  %v1636_v22 = vunpack.c.l.bf16 %v1592_v9 }
 0x238   : > { %v2250_v38 = vadd.f32 %v2249_v63, %v2248_v27  ;;  %v2256_v1 = vadd.f32 %v2255_v7, %v2254_v30  ;;  %v2889_v36 = vpop.eup %2888  ;;  %v1484_v8 = vunpack.c.l.bf16 %v4060_v47  ;;  %v1485_v44 = vunpack.c.h.bf16 %v4060_v47  ;;  %v890_v27 = vpop.f32.mrf.mxu3 }
 0x239   : > { %2892 = vtanh.f32 %v1447_v12  ;;  %v1637_v39 = vunpack.c.h.bf16 %v1592_v9  ;;  %v1202_v56 = vpack.c.bf16 %v1137_v17, %v1136_v0  ;;  %v1611_v49 = vpack.c.bf16 %v2889_v36, %v2887_v42 }
 0x23a   : > { %v2285_v25 = vmul.f32 0.015625, %v2250_v38  ;;  %v2286_v31 = vmul.f32 0.015625, %v2256_v1  ;;  %2894 = vtanh.f32 %v1484_v8  ;;  %v2045_v29 = vunpack.c.h.bf16 %v4027_v43 }
 0x23b   : > { %2896 = vtanh.f32 %v1485_v44  ;;  %v2054_v14 = vunpack.c.l.bf16 %v4056_v61  ;;  %v4078_v45 = vpack.c.bf16 %v1935_v37, %v1934_v54  ;;  %v1864_v6 = vunpack.c.l.bf16 %v1806_v28 }
 0x23c   : > { %v2304_v53 = vrot.slane %v2285_v25, 4  ;;  %v2305_v11 = vrot.slane %v2286_v31, 3  ;;  %v1865_v24 = vunpack.c.h.bf16 %v1806_v28  ;;  %v1716_v41 = vadd.f32 1.0, %v1636_v22 }
 0x23d   : > { %v1071_v30 = vmul.f32 %v3805_v32, %v917_v55  ;;  %v2891_v20 = vpop.eup %2890  ;;  %v1717_v13 = vadd.f32 1.0, %v1637_v39  ;;  %v1256_v34 = vunpack.c.l.bf16 %v1202_v56  ;;  %v1257_v52 = vunpack.c.h.bf16 %v1202_v56 }
 0x23e   : > { %v4080_v21 = vsel %vm2315_vm4, %v2304_v53, %v2305_v11  ;;  %v1043_v63 = vmul.f32 %v3963_v50, %v967_v23  ;;  %v1174_v9 = vadd.f32 %v3823_v3, %v4042_v35  ;;  %v1674_v54 = vunpack.c.l.bf16 %v1611_v49 }
 0x23f   : > { %v2893_v7 = vpop.eup %2892  ;;  %v1675_v17 = vunpack.c.h.bf16 %v1611_v49  ;;  %v1175_v42 = vadd.f32 %v3818_v58, %v1071_v30  ;;  %v2055_v38 = vunpack.c.h.bf16 %v4056_v61  ;;  %v2160_v1 = vadd.f32 %v2054_v14, %v2044_v62  ;;  %v919_v14 = vpop.f32.mrf.mxu0 }
 0x240   : > { %v2895_v37 = vpop.eup %2894  ;;  %v1080_v0 = vmul.f32 %v3810_v40, %v890_v27  ;;  %v1042_v36 = vmul.f32 %v3947_v57, %v938_v59  ;;  %v2064_v25 = vunpack.c.l.bf16 %v4078_v45  ;;  %v1944_v35 = vmul.f32 %v1864_v6, %v1464_v15  ;;  %v941_v15 = vpop.f32.mrf.mxu1 }
 0x241   : > { %v2897_v28 = vpop.eup %2896  ;;  %v1945_v31 = vmul.f32 %v1865_v24, %v1465_v19  ;;  %v1221_v22 = vpack.c.bf16 %v1175_v42, %v1174_v9  ;;  %v4097_v39 = vpack.c.bf16 %v1717_v13, %v1716_v41  ;;  %v1336_v61 = vmul.f32 0.5, %v1256_v34  ;;  %v970_v41 = vpop.f32.mrf.mxu2 }
 0x242   : > { %v1337_v56 = vmul.f32 0.5, %v1257_v52  ;;  %v1147_v43 = vadd.f32 %v3966_v60, %v1043_v63  ;;  %v1754_v62 = vadd.f32 1.0, %v1674_v54  ;;  %v1755_v40 = vadd.f32 1.0, %v1675_v17 }
 0x243   : > { %v1294_v55 = vunpack.c.l.bf16 %v1221_v22  ;;  %v1295_v59 = vunpack.c.h.bf16 %v1221_v22  ;;  %v2167_v53 = vadd.f32 %v2055_v38, %v2045_v29  ;;  %v1597_v11 = vpack.c.bf16 %v2893_v7, %v2891_v20 }
 0x244   : > { %v1616_v49 = vpack.c.bf16 %v2897_v28, %v2895_v37  ;;  %v1146_v23 = vadd.f32 %v3955_v33, %v1042_v36  ;;  %v2065_v46 = vunpack.c.h.bf16 %v4078_v45  ;;  %v1184_v19 = vadd.f32 %v3823_v3, %v1080_v0 }
 0x245   : > { %v1374_v6 = vmul.f32 0.5, %v1294_v55  ;;  %v1375_v24 = vmul.f32 0.5, %v1295_v59  ;;  %v2161_v27 = vadd.f32 %v2160_v1, %v2064_v25  ;;  %v4103_v30 = vpack.c.bf16 %v1945_v31, %v1944_v35 }
 0x246   : > { %v4105_v13 = vpack.c.bf16 %v1337_v56, %v1336_v61  ;;  %v1207_v34 = vpack.c.bf16 %v1147_v43, %v1146_v23  ;;  %v1836_v29 = vunpack.c.l.bf16 %v4097_v39  ;;  %v1811_v20 = vpack.c.bf16 %v1755_v40, %v1754_v62 }
 0x247   : > { %v4108_v52 = vpack.c.bf16 %v1375_v24, %v1374_v6  ;;  %v1081_v63 = vmul.f32 %v3805_v32, %v919_v14  ;;  %v1837_v45 = vunpack.c.h.bf16 %v4097_v39  ;;  %v1646_v7 = vunpack.c.l.bf16 %v1597_v11 }
 0x248   : > { %v1684_v3 = vunpack.c.l.bf16 %v1616_v49  ;;  %v1685_v9 = vunpack.c.h.bf16 %v1616_v49  ;;  %v1647_v54 = vunpack.c.h.bf16 %v1597_v11  ;;  %v1266_v37 = vunpack.c.l.bf16 %v1207_v34  ;;  %v943_v55 = vpop.f32.mrf.mxu1 }
 0x249   : > { %v1494_v17 = vunpack.c.l.bf16 %v4108_v52  ;;  %v1495_v42 = vunpack.c.h.bf16 %v4108_v52  ;;  %v2074_v38 = vunpack.c.l.bf16 %v4103_v30  ;;  %v1456_v1 = vunpack.c.l.bf16 %v4105_v13  ;;  %v972_v23 = vpop.f32.mrf.mxu2 }
 0x24a   : > { %v1267_v0 = vunpack.c.h.bf16 %v1207_v34  ;;  %v1185_v36 = vadd.f32 %v3818_v58, %v1081_v63  ;;  %v1874_v28 = vunpack.c.l.bf16 %v1811_v20  ;;  %v1875_v32 = vunpack.c.h.bf16 %v1811_v20 }
 0x24b   : > { %v1457_v25 = vunpack.c.h.bf16 %v4105_v13  ;;  %2898 = vtanh.f32 %v1494_v17  ;;  %v1764_v35 = vadd.f32 1.0, %v1684_v3  ;;  %v1765_v31 = vadd.f32 1.0, %v1685_v9 }
 0x24c   : > { %2900 = vtanh.f32 %v1495_v42  ;;  %v1226_v22 = vpack.c.bf16 %v1185_v36, %v1184_v19  ;;  %v1726_v39 = vadd.f32 1.0, %v1646_v7  ;;  %v1727_v61 = vadd.f32 1.0, %v1647_v54 }
 0x24d   : > { %v1346_v56 = vmul.f32 0.5, %v1266_v37  ;;  %v1347_v43 = vmul.f32 0.5, %v1267_v0  ;;  %2902 = vtanh.f32 %v1456_v1  ;;  %v1053_v40 = vmul.f32 %v3963_v50, %v970_v41 }
 0x24e   : > { %v1304_v58 = vunpack.c.l.bf16 %v1226_v22  ;;  %v1305_v62 = vunpack.c.h.bf16 %v1226_v22  ;;  %v1954_v59 = vmul.f32 %v1874_v28, %v1474_v26  ;;  %v1955_v11 = vmul.f32 %v1875_v32, %v1475_v10 }
 0x24f   : > { %2904 = vtanh.f32 %v1457_v25  ;;  %v1052_v49 = vmul.f32 %v3947_v57, %v941_v15  ;;  %v2168_v14 = vadd.f32 %v2167_v53, %v2065_v46  ;;  %v1816_v19 = vpack.c.bf16 %v1765_v31, %v1764_v35 }
 0x250   : > { %v1384_v6 = vmul.f32 0.5, %v1304_v58  ;;  %v1385_v24 = vmul.f32 0.5, %v1305_v62  ;;  %v2075_v41 = vunpack.c.h.bf16 %v4103_v30  ;;  %v4135_v20 = vmul.f32 %v1836_v29, %v1436_v4  ;;  %v946_v58 = vpop.f32.mrf.mxu1 }
 0x251   : > { %v2899_v34 = vpop.eup %2898  ;;  %v4137_v26 = vpack.c.bf16 %v1347_v43, %v1346_v56  ;;  %v1157_v2 = vadd.f32 %v3966_v60, %v1053_v40  ;;  %v4142_v15 = vmul.f32 %v1837_v45, %v1437_v5  ;;  %v1062_v46 = vmul.f32 %v3947_v57, %v943_v55 }
 0x252   : > { %v2901_v10 = vpop.eup %2900  ;;  %v4144_v53 = vpack.c.bf16 %v1385_v24, %v1384_v6  ;;  %v1063_v63 = vmul.f32 %v3963_v50, %v972_v23  ;;  %v4148_v30 = vadd.f32 %v2161_v27, %v2074_v38  ;;  %v4150_v7 = vpack.c.bf16 %v1955_v11, %v1954_v59  ;;  %v975_v11 = vpop.f32.mrf.mxu2 }
 0x253   : > { %v4152_v4 = vpack.c.bf16 %v1727_v61, %v1726_v39  ;;  %v1156_v29 = vadd.f32 %v3955_v33, %v1052_v49  ;;  %v2903_v3 = vpop.eup %2902  ;;  %v1884_v9 = vunpack.c.l.bf16 %v1816_v19  ;;  %v1621_v54 = vpack.c.bf16 %v2901_v10, %v2899_v34 }
 0x254   : > { %v1504_v16 = vunpack.c.l.bf16 %v4144_v53  ;;  %v1505_v5 = vunpack.c.h.bf16 %v4144_v53  ;;  %v1885_v37 = vunpack.c.h.bf16 %v1816_v19  ;;  %v1466_v0 = vunpack.c.l.bf16 %v4137_v26 }
 0x255   : > { %v2905_v45 = vpop.eup %2904  ;;  %v1212_v36 = vpack.c.bf16 %v1157_v2, %v1156_v29  ;;  %v1167_v27 = vadd.f32 %v3966_v60, %v1063_v63  ;;  %v1694_v38 = vunpack.c.l.bf16 %v1621_v54  ;;  %v1695_v28 = vunpack.c.h.bf16 %v1621_v54 }
 0x256   : > { %2906 = vtanh.f32 %v1504_v16  ;;  %v1166_v32 = vadd.f32 %v3955_v33, %v1062_v46  ;;  %v1467_v35 = vunpack.c.h.bf16 %v4137_v26  ;;  %v1602_v39 = vpack.c.bf16 %v2905_v45, %v2903_v3 }
 0x257   : > { %2908 = vtanh.f32 %v1505_v5  ;;  %v1276_v31 = vunpack.c.l.bf16 %v1212_v36  ;;  %v1277_v22 = vunpack.c.h.bf16 %v1212_v36  ;;  %v1774_v61 = vadd.f32 1.0, %v1694_v38 }
 0x258   : > { %v1775_v56 = vadd.f32 1.0, %v1695_v28  ;;  %v1217_v43 = vpack.c.bf16 %v1167_v27, %v1166_v32  ;;  %v1964_v62 = vmul.f32 %v1884_v9, %v1484_v8  ;;  %v1965_v40 = vmul.f32 %v1885_v37, %v1485_v44 }
 0x259   : > { %v1356_v55 = vmul.f32 0.5, %v1276_v31  ;;  %v1357_v59 = vmul.f32 0.5, %v1277_v22  ;;  %2910 = vtanh.f32 %v1466_v0  ;;  %v2169_v6 = vadd.f32 %v2168_v14, %v2075_v41 }
 0x25a   : > { %v1821_v49 = vpack.c.bf16 %v1775_v56, %v1774_v61  ;;  %v1286_v23 = vunpack.c.l.bf16 %v1217_v43  ;;  %v1287_v19 = vunpack.c.h.bf16 %v1217_v43  ;;  %v1846_v24 = vunpack.c.l.bf16 %v4152_v4 }
 0x25b   : > { %2912 = vtanh.f32 %v1467_v35  ;;  %v4174_v34 = vpack.c.bf16 %v1357_v59, %v1356_v55  ;;  %v2084_v63 = vunpack.c.l.bf16 %v4150_v7  ;;  %v2085_v29 = vunpack.c.h.bf16 %v4150_v7 }
 0x25c   : > { %v2907_v8 = vpop.eup %2906  ;;  %v1894_v47 = vunpack.c.l.bf16 %v1821_v49  ;;  %v1895_v44 = vunpack.c.h.bf16 %v1821_v49  ;;  %v1366_v2 = vmul.f32 0.5, %v1286_v23  ;;  %v1367_v10 = vmul.f32 0.5, %v1287_v19 }
 0x25d   : > { %v2909_v46 = vpop.eup %2908  ;;  %v1476_v3 = vunpack.c.l.bf16 %v4174_v34  ;;  %v1477_v14 = vunpack.c.h.bf16 %v4174_v34  ;;  %v2016_v41 = vpack.c.bf16 %v1965_v40, %v1964_v62  ;;  %v1656_v9 = vunpack.c.l.bf16 %v1602_v39  ;;  %v948_v62 = vpop.f32.mrf.mxu1 }
 0x25e   : > { %v1657_v54 = vunpack.c.h.bf16 %v1602_v39  ;;  %v1626_v45 = vpack.c.bf16 %v2909_v46, %v2907_v8  ;;  %v1974_v37 = vmul.f32 %v1894_v47, %v1494_v17  ;;  %v1975_v36 = vmul.f32 %v1895_v44, %v1495_v42 }
 0x25f   : > { %2914 = vtanh.f32 %v1476_v3  ;;  %v4186_v27 = vpack.c.bf16 %v1367_v10, %v1366_v2  ;;  %v2911_v7 = vpop.eup %2910  ;;  %v1072_v32 = vmul.f32 %v3947_v57, %v946_v58  ;;  %v1073_v31 = vmul.f32 %v3963_v50, %v975_v11  ;;  %v977_v11 = vpop.f32.mrf.mxu2 }
 0x260   : > { %v1704_v38 = vunpack.c.l.bf16 %v1626_v45  ;;  %v1705_v28 = vunpack.c.h.bf16 %v1626_v45  ;;  %v2163_v39 = vadd.f32 %v4148_v30, %v2084_v63  ;;  %v1847_v17 = vunpack.c.h.bf16 %v4152_v4 }
 0x261   : > { %v2913_v22 = vpop.eup %2912  ;;  %2916 = vtanh.f32 %v1477_v14  ;;  %v1486_v52 = vunpack.c.l.bf16 %v4186_v27  ;;  %v2170_v42 = vadd.f32 %v2169_v6, %v2085_v29  ;;  %v1736_v61 = vadd.f32 1.0, %v1656_v9 }
 0x262   : > { %v1784_v56 = vadd.f32 1.0, %v1704_v38  ;;  %v1785_v43 = vadd.f32 1.0, %v1705_v28  ;;  %v2094_v40 = vunpack.c.l.bf16 %v2016_v41  ;;  %v1737_v55 = vadd.f32 1.0, %v1657_v54 }
 0x263   : > { %v2021_v58 = vpack.c.bf16 %v1975_v36, %v1974_v37  ;;  %v1487_v59 = vunpack.c.h.bf16 %v4186_v27  ;;  %2918 = vtanh.f32 %v1486_v52  ;;  %v1176_v30 = vadd.f32 %v3955_v33, %v1072_v32 }
 0x264   : > { %v1826_v49 = vpack.c.bf16 %v1785_v43, %v1784_v56  ;;  %v1177_v23 = vadd.f32 %v3966_v60, %v1073_v31  ;;  %v2095_v6 = vunpack.c.h.bf16 %v2016_v41  ;;  %v1607_v8 = vpack.c.bf16 %v2913_v22, %v2911_v7 }
 0x265   : > { %v2915_v19 = vpop.eup %2914  ;;  %2920 = vtanh.f32 %v1487_v59  ;;  %v1082_v47 = vmul.f32 %v3947_v57, %v948_v62  ;;  %v1083_v46 = vmul.f32 %v3963_v50, %v977_v11  ;;  %v2164_v29 = vadd.f32 %v2163_v39, %v2094_v40 }
 0x266   : > { %v1904_v44 = vunpack.c.l.bf16 %v1826_v49  ;;  %v1905_v2 = vunpack.c.h.bf16 %v1826_v49  ;;  %v1222_v10 = vpack.c.bf16 %v1177_v23, %v1176_v30  ;;  %v1802_v9 = vpack.c.bf16 %v1737_v55, %v1736_v61 }
 0x267   : > { %v2917_v63 = vpop.eup %2916  ;;  %v2104_v54 = vunpack.c.l.bf16 %v2021_v58  ;;  %v2105_v45 = vunpack.c.h.bf16 %v2021_v58  ;;  %v2171_v38 = vadd.f32 %v2170_v42, %v2095_v6  ;;  %v1186_v28 = vadd.f32 %v3955_v33, %v1082_v47 }
 0x268   : > { %v1984_v37 = vmul.f32 %v1904_v44, %v1504_v16  ;;  %v1985_v41 = vmul.f32 %v1905_v2, %v1505_v5  ;;  %v1612_v36 = vpack.c.bf16 %v2917_v63, %v2915_v19  ;;  %v1296_v7 = vunpack.c.l.bf16 %v1222_v10 }
 0x269   : > { %v1297_v57 = vunpack.c.h.bf16 %v1222_v10  ;;  %v1187_v32 = vadd.f32 %v3966_v60, %v1083_v46  ;;  %v2919_v50 = vpop.eup %2918  ;;  %v1666_v31 = vunpack.c.l.bf16 %v1607_v8  ;;  %v1667_v22 = vunpack.c.h.bf16 %v1607_v8 }
 0x26a   : > { %v2026_v39 = vpack.c.bf16 %v1985_v41, %v1984_v37  ;;  %v1376_v61 = vmul.f32 0.5, %v1296_v7  ;;  %v2165_v43 = vadd.f32 %v2164_v29, %v2104_v54  ;;  %v2172_v62 = vadd.f32 %v2171_v38, %v2105_v45 }
 0x26b   : > { %v2921_v56 = vpop.eup %2920  ;;  %v1377_v16 = vmul.f32 0.5, %v1297_v57  ;;  %v1227_v40 = vpack.c.bf16 %v1187_v32, %v1186_v28  ;;  %v1676_v55 = vunpack.c.l.bf16 %v1612_v36  ;;  %v1677_v58 = vunpack.c.h.bf16 %v1612_v36 }
 0x26c   : > { %v2114_v53 = vunpack.c.l.bf16 %v2026_v39  ;;  %v2115_v5 = vunpack.c.h.bf16 %v2026_v39  ;;  %v1856_v42 = vunpack.c.l.bf16 %v1802_v9  ;;  %v1617_v11 = vpack.c.bf16 %v2921_v56, %v2919_v50 }
 0x26d   : > { %v4210_v49 = vpack.c.bf16 %v1377_v16, %v1376_v61  ;;  %v1306_v33 = vunpack.c.l.bf16 %v1227_v40  ;;  %v1857_v60 = vunpack.c.h.bf16 %v1802_v9  ;;  %v1746_v30 = vadd.f32 1.0, %v1666_v31 }
 0x26e   : > { %v2166_v23 = vadd.f32 %v2165_v43, %v2114_v53  ;;  %v2173_v19 = vadd.f32 %v2172_v62, %v2115_v5  ;;  %v1747_v6 = vadd.f32 1.0, %v1667_v22  ;;  %v1307_v44 = vunpack.c.h.bf16 %v1227_v40 }
 0x26f   : > { %v1496_v8 = vunpack.c.l.bf16 %v4210_v49  ;;  %v1497_v47 = vunpack.c.h.bf16 %v4210_v49  ;;  %v1756_v46 = vadd.f32 1.0, %v1676_v55  ;;  %v1757_v63 = vadd.f32 1.0, %v1677_v58 }
 0x270   : > { %v2257_v2 = vrot.slane %v2166_v23, 4  ;;  %v2263_v10 = vrot.slane %v2173_v19, 4  ;;  %v1686_v29 = vunpack.c.l.bf16 %v1617_v11  ;;  %v1687_v54 = vunpack.c.h.bf16 %v1617_v11 }
 0x271   : > { %2922 = vtanh.f32 %v1496_v8  ;;  %v1386_v45 = vmul.f32 0.5, %v1306_v33  ;;  %v4218_v9 = vpack.c.bf16 %v4142_v15, %v4135_v20  ;;  %v1926_v37 = vmul.f32 %v1846_v24, %v1446_v48 }
 0x272   : > { %v2258_v41 = vadd.f32 %v2257_v2, %v2166_v23  ;;  %v2264_v36 = vadd.f32 %v2263_v10, %v2173_v19  ;;  %v1927_v7 = vmul.f32 %v1847_v17, %v1447_v12  ;;  %v1807_v38 = vpack.c.bf16 %v1747_v6, %v1746_v30 }
 0x273   : > { %2924 = vtanh.f32 %v1497_v47  ;;  %v1387_v57 = vmul.f32 0.5, %v1307_v44  ;;  %v1936_v20 = vmul.f32 %v1856_v42, %v1456_v1  ;;  %v1937_v15 = vmul.f32 %v1857_v60, %v1457_v25 }
 0x274   : > { %v2259_v28 = vrot.slane %v2258_v41, 2  ;;  %v2265_v48 = vrot.slane %v2264_v36, 2  ;;  %v1812_v24 = vpack.c.bf16 %v1757_v63, %v1756_v46  ;;  %v1766_v32 = vadd.f32 1.0, %v1686_v29 }
 0x275   : > { %v1767_v50 = vadd.f32 1.0, %v1687_v54  ;;  %v4234_v18 = vpack.c.bf16 %v1387_v57, %v1386_v45  ;;  %v2046_v12 = vunpack.c.l.bf16 %v4218_v9  ;;  %v2047_v4 = vunpack.c.h.bf16 %v4218_v9 }
 0x276   : > { %v2260_v17 = vadd.f32 %v2259_v28, %v2258_v41  ;;  %v2266_v31 = vadd.f32 %v2265_v48, %v2264_v36  ;;  %v1866_v39 = vunpack.c.l.bf16 %v1807_v38  ;;  %v1867_v61 = vunpack.c.h.bf16 %v1807_v38 }
 0x277   : > { %v2923_v22 = vpop.eup %2922  ;;  %v1506_v1 = vunpack.c.l.bf16 %v4234_v18  ;;  %v1507_v13 = vunpack.c.h.bf16 %v4234_v18  ;;  %v1997_v25 = vpack.c.bf16 %v1927_v7, %v1926_v37  ;;  %v2002_v56 = vpack.c.bf16 %v1937_v15, %v1936_v20 }
 0x278   : > { %v2261_v43 = vrot.slane %v2260_v17, 1  ;;  %v2267_v62 = vrot.slane %v2266_v31, 1  ;;  %v1876_v40 = vunpack.c.l.bf16 %v1812_v24  ;;  %v1877_v53 = vunpack.c.h.bf16 %v1812_v24 }
 0x279   : > { %v2925_v16 = vpop.eup %2924  ;;  %v1817_v5 = vpack.c.bf16 %v1767_v50, %v1766_v32  ;;  %2926 = vtanh.f32 %v1506_v1  ;;  %v1946_v11 = vmul.f32 %v1866_v39, %v1466_v0  ;;  %v1947_v33 = vmul.f32 %v1867_v61, %v1467_v35 }
 0x27a   : > { %v2262_v55 = vadd.f32 %v2261_v43, %v2260_v17  ;;  %v2268_v58 = vadd.f32 %v2267_v62, %v2266_v31  ;;  %v1622_v42 = vpack.c.bf16 %v2925_v16, %v2923_v22  ;;  %2928 = vtanh.f32 %v1507_v13 }
 0x27b   : > { %v1956_v6 = vmul.f32 %v1876_v40, %v1476_v3  ;;  %v1957_v44 = vmul.f32 %v1877_v53, %v1477_v14  ;;  %v1886_v2 = vunpack.c.l.bf16 %v1817_v5  ;;  %v1887_v10 = vunpack.c.h.bf16 %v1817_v5 }
 0x27c   : > { %v2287_v60 = vmul.f32 0.015625, %v2262_v55  ;;  %v2288_v30 = vmul.f32 0.015625, %v2268_v58  ;;  %v1696_v23 = vunpack.c.l.bf16 %v1622_v42  ;;  %v1697_v19 = vunpack.c.h.bf16 %v1622_v42 }
 0x27d   : > { %v2056_v29 = vunpack.c.l.bf16 %v1997_v25  ;;  %v2057_v54 = vunpack.c.h.bf16 %v1997_v25  ;;  %v2066_v45 = vunpack.c.l.bf16 %v2002_v56  ;;  %v2067_v34 = vunpack.c.h.bf16 %v2002_v56 }
 0x27e   : > { %v2306_v46 = vrot.slane %v2287_v60, 2  ;;  %v2307_v0 = vrot.slane %v2288_v30, 1  ;;  %v1776_v63 = vadd.f32 1.0, %v1696_v23  ;;  %v1777_v26 = vadd.f32 1.0, %v1697_v19 }
 0x27f   : > { %v2927_v35 = vpop.eup %2926  ;;  %v2007_v3 = vpack.c.bf16 %v1947_v33, %v1946_v11  ;;  %v1966_v36 = vmul.f32 %v1886_v2, %v1486_v52  ;;  %v1967_v7 = vmul.f32 %v1887_v10, %v1487_v59  ;;  %v2012_v20 = vpack.c.bf16 %v1957_v44, %v1956_v6 }
 0x280   : > { %v2929_v9 = vpop.eup %2928  ;;  %v2318_v14 = vsel %vm2317_vm5, %v2306_v46, %v2307_v0  ;;  %v1822_v37 = vpack.c.bf16 %v1777_v26, %v1776_v63  ;;  %v2174_v48 = vadd.f32 %v2056_v29, %v2046_v12  ;;  %v2181_v24 = vadd.f32 %v2057_v54, %v2047_v4 }
 0x281   : > { %v2320_v41 = vsel %vm2319_vm6, %v4080_v21, %v2318_v14  ;;  %v1627_v38 = vpack.c.bf16 %v2929_v9, %v2927_v35  ;;  %v2076_v17 = vunpack.c.l.bf16 %v2007_v3  ;;  %v2077_v31 = vunpack.c.h.bf16 %v2007_v3 }
 0x282   : > { %v2322_v57 = vsel %vm2321_vm7, %v3927_v51, %v2320_v41  ;;  %v1896_v15 = vunpack.c.l.bf16 %v1822_v37  ;;  %v1897_v28 = vunpack.c.h.bf16 %v1822_v37  ;;  %v2017_v52 = vpack.c.bf16 %v1967_v7, %v1966_v36 }
 0x283   : > { %2326 = vst [vmem:[%s4256_s12] sm:$0xff] %v2322_v57  ;;  %v1706_v32 = vunpack.c.l.bf16 %v1627_v38  ;;  %v1707_v50 = vunpack.c.h.bf16 %v1627_v38  ;;  %v2175_v51 = vadd.f32 %v2174_v48, %v2066_v45  ;;  %v2182_v39 = vadd.f32 %v2181_v24, %v2067_v34 }
 0x284   : > { %v1976_v21 = vmul.f32 %v1896_v15, %v1496_v8  ;;  %v1977_v27 = vmul.f32 %v1897_v28, %v1497_v47  ;;  %v2086_v61 = vunpack.c.l.bf16 %v2012_v20  ;;  %v2087_v25 = vunpack.c.h.bf16 %v2012_v20 }
 0x285   : > { %v1786_v59 = vadd.f32 1.0, %v1706_v32  ;;  %v1787_v22 = vadd.f32 1.0, %v1707_v50  ;;  %v2176_v56 = vadd.f32 %v2175_v51, %v2076_v17  ;;  %v2183_v43 = vadd.f32 %v2182_v39, %v2077_v31 }
 0x286   : > { %v2022_v12 = vpack.c.bf16 %v1977_v27, %v1976_v21  ;;  %v2096_v62 = vunpack.c.l.bf16 %v2017_v52  ;;  %v2097_v16 = vunpack.c.h.bf16 %v2017_v52  ;;  %v2327_v45 = vlaneseq }
 0x287   : > { %v1827_v4 = vpack.c.bf16 %v1787_v22, %v1786_v59  ;;  %v2177_v5 = vadd.f32 %v2176_v56, %v2086_v61  ;;  %v2184_v8 = vadd.f32 %v2183_v43, %v2087_v25 }
 0x288   : > { %v2106_v55 = vunpack.c.l.bf16 %v2022_v12  ;;  %v2107_v49 = vunpack.c.h.bf16 %v2022_v12  ;;  %vm2329_vm8 = vcmp.lt.s32.totalorder %v2327_v45, 256 }
 0x289   : > { %v1906_v40 = vunpack.c.l.bf16 %v1827_v4  ;;  %v1907_v53 = vunpack.c.h.bf16 %v1827_v4  ;;  %v2178_v42 = vadd.f32 %v2177_v5, %v2096_v62  ;;  %v2185_v11 = vadd.f32 %v2184_v8, %v2097_v16 }
 0x28b   : > { %v1986_v47 = vmul.f32 %v1906_v40, %v1506_v1  ;;  %v1987_v58 = vmul.f32 %v1907_v53, %v1507_v13  ;;  %v2179_v60 = vadd.f32 %v2178_v42, %v2106_v55  ;;  %v2186_v30 = vadd.f32 %v2185_v11, %v2107_v49 }
 0x28d   : > { %v2027_v33 = vpack.c.bf16 %v1987_v58, %v1986_v47 }
 0x28f   : > { %v2116_v23 = vunpack.c.l.bf16 %v2027_v33  ;;  %v2117_v19 = vunpack.c.h.bf16 %v2027_v33 }
 0x291   : > { %v2180_v6 = vadd.f32 %v2179_v60, %v2116_v23  ;;  %v2187_v44 = vadd.f32 %v2186_v30, %v2117_v19 }
 0x293   : > { %v2269_v2 = vrot.slane %v2180_v6, 4  ;;  %v2275_v10 = vrot.slane %v2187_v44, 4 }
 0x295   : > { %v2270_v46 = vadd.f32 %v2269_v2, %v2180_v6  ;;  %v2276_v0 = vadd.f32 %v2275_v10, %v2187_v44 }
 0x297   : > { %v2271_v63 = vrot.slane %v2270_v46, 2  ;;  %v2277_v26 = vrot.slane %v2276_v0, 2 }
 0x299   : > { %v2272_v1 = vadd.f32 %v2271_v63, %v2270_v46  ;;  %v2278_v35 = vadd.f32 %v2277_v26, %v2276_v0 }
 0x29b   : > { %v2273_v18 = vrot.slane %v2272_v1, 1  ;;  %v2279_v13 = vrot.slane %v2278_v35, 1 }
 0x29d   : > { %v2274_v29 = vadd.f32 %v2273_v18, %v2272_v1  ;;  %v2280_v54 = vadd.f32 %v2279_v13, %v2278_v35 }
 0x29f   : > { %v2290_v9 = vmul.f32 0.015625, %v2280_v54  ;;  %v2289_v34 = vmul.f32 0.015625, %v2274_v29 }
 0x2a1   : > { %v2308_v3 = vrot.slane %v2290_v9, 7 }
 0x2a3   : > { %v2323_v14 = vsel %vm2309_vm1, %v2289_v34, %v2308_v3 }
 0x2a4   : > { %2331 = vst.msk [vmem:[%s4256_s12 + $0x8] sm:$0x3] %vm2329_vm8, %v2323_v14 }
 0x2a5 PF: > { %s21_s26 = sadd.s32 1, %s3150_s26   ;;  %s4297_s24 = smov %s3146_s25 }
 0x2a6   : > { %p18_p8 = scmp.ge.s32.totalorder %s21_s26, 4   ;;  %s4298_s25 = smov %s4300_s23 }
 0x2a8   :  { %20 = sbr.rel (!%p18_p8) target bundleno = 5 (0x5), region = 111 }
 0x2ad   :  { %2351 = vsyncpa [#allocation4], 1 }
 0x2ae   :  { %2353 = vsyncpa [#allocation4 + $0x1], 1 }
 0x2af   :  { %2354 = vsyncpa [#allocation6], 1 }
 0x2b0   :  { %2355 = vsyncpa [#allocation9], 1 }
 0x2b1   :  { %2356 = vsyncpa [#allocation12], 1 }

</bundles_post_ra>
